<compile_context>
chip_gen: v7x
topology: tpu7x:2x2x1
jax: 0.10.0
libtpu: 0.0.40
codegen_flags: <defaults>
</compile_context>

<pallas_src>
import math

import jax
import jax.numpy as jnp
from jax.experimental import pallas as pl
from jax.experimental.pallas import tpu as pltpu

KPARAM_ORDER = [
    "w_pre", "w_fc1", "wg_pre", "wl_hid", "wl_g",
    "w_ro", "w_h1", "w_h2", "w_pred", "vec_h", "vec_h2",
]


# ----------------------------- kernel ---------------------------------------
def gcn_kernel(x_ref, a_ref,
               w_pre_ref, w_fc1_ref, wg_pre_ref,
               wl_hid_ref, wl_g_ref,
               w_ro_ref, w_h1_ref, w_h2_ref, w_pred_ref,
               vh_ref, vh2_ref,
               out_ref):
    # One grid program == one block of G graphs; everything fits in VMEM.
    G, N, Din = x_ref.shape
    H = w_pre_ref.shape[1]
    f32 = jnp.float32
    bf16 = jnp.bfloat16

    x0 = x_ref[...]          # (G, N, Din) bf16
    A = a_ref[...]           # (G, N, N)   bf16

    def mm(a, w):            # bf16 x bf16 -> f32 accumulate (MXU)
        return jnp.dot(a, w, preferred_element_type=f32)

    def agg(xb):             # per-graph A @ x, f32 accumulate
        return jnp.einsum("gij,gjd->gid", A, xb, preferred_element_type=f32)

    def gated(x_in, x_new, wg, bg):
        # Fused gate: sigmoid([x_in | x_new] @ [Wg1; Wg2] + (bg1 + bg2))
        cat = jnp.concatenate([x_in.astype(bf16), x_new.astype(bf16)], axis=-1)
        g = jax.nn.sigmoid(mm(cat, wg) + bg)
        return x_new * g + x_in * (1.0 - g)

    # ---- graph_pre: Graph_Conv(Din -> H) with gated skip --------------------
    xn = agg(x0).reshape(G * N, Din).astype(bf16)
    xn = mm(xn, w_pre_ref[...]) + vh_ref[0:1, :]                   # A@x -> fc_hidden
    xp = mm(x0.reshape(G * N, Din), w_fc1_ref[...]) + vh_ref[1:2, :]  # fc_1(x)
    x = gated(xp, xn, wg_pre_ref[...], vh_ref[2:3, :])             # (G*N, H) f32

    # ---- stacked Graph_Conv(H -> H) layers (static unroll) ------------------
    L = wl_hid_ref.shape[0]
    for l in range(L):
        xn = agg(x.astype(bf16).reshape(G, N, H)).reshape(G * N, H).astype(bf16)
        xn = mm(xn, wl_hid_ref[l]) + vh_ref[3 + 2 * l:4 + 2 * l, :]
        x = gated(x, xn, wl_g_ref[l], vh_ref[4 + 2 * l:5 + 2 * l, :])

    # ---- Readout: linearity => sum over nodes first, then one (G,H)@(H,H2) --
    # sum_n (x_n @ W + b) == (sum_n x_n) @ W + N*b  (exact: dropout=id, BN folded)
    xs = jnp.sum(x.reshape(G, N, H), axis=1)                       # (G, H) f32
    s = mm(xs.astype(bf16), w_ro_ref[...]) + float(N) * vh2_ref[0:1, :]
    s = jnp.maximum(s * vh2_ref[1:2, :] + vh2_ref[2:3, :], 0.0)    # folded BN + ReLU

    # ---- Head: fc_h1 -> BN(folded) -> fc_h2 -> fc_pred -> sigmoid -----------
    h1 = mm(s.astype(bf16), w_h1_ref[...]) + vh2_ref[3:4, :]
    h1 = h1 * vh2_ref[4:5, :] + vh2_ref[5:6, :]
    h2 = mm(h1.astype(bf16), w_h2_ref[...]) + vh2_ref[6:7, :]
    logit = mm(h2.astype(bf16), w_pred_ref[...]) + vh2_ref[7:8, 0:1]  # (G, 1)
    out_ref[...] = jax.nn.sigmoid(logit)


# ----------------------------- wrapper ---------------------------------------
def gcn_forward(x, A, kparams, *, graphs_per_step=None):
    B, N, Din = x.shape
    if graphs_per_step is None:
        graphs_per_step = max(1, min(B, max(1, 128 // N)))   # aim for G*N ~ 128
    G = min(graphs_per_step, B)
    nb = -(-B // G)            # cdiv
    Bp = nb * G
    if Bp != B:
        pad = Bp - B
        x = jnp.pad(x, ((0, pad), (0, 0), (0, 0)))
        A = jnp.pad(A, ((0, pad), (0, 0), (0, 0)))
    # bf16 MXU operands (halves the HBM->VMEM bytes for x / A too).
    x = x.astype(jnp.bfloat16)
    A = A.astype(jnp.bfloat16)

    weights = [kparams[k] for k in KPARAM_ORDER]

    def full_spec(a):
        nd = a.ndim
        return pl.BlockSpec(a.shape, lambda b, nd=nd: (0,) * nd)

    in_specs = [
        pl.BlockSpec((G, N, Din), lambda b: (b, 0, 0)),   # block of G graphs
        pl.BlockSpec((G, N, N), lambda b: (b, 0, 0)),
    ] + [full_spec(w) for w in weights]

    out = pl.pallas_call(
        gcn_kernel,
        out_shape=jax.ShapeDtypeStruct((nb, G, 1), jnp.float32),
        grid=(nb,),
        in_specs=in_specs,
        out_specs=pl.BlockSpec((None, G, 1), lambda b: (b, 0, 0)),
        compiler_params=pltpu.CompilerParams(dimension_semantics=("parallel",)),
    )(x, A, *weights)
    return out.reshape(Bp, 1)[:B]


# ------------------- parameter init (deterministic, no checkpoint) -----------
def init_params(key, din, h, h2, num_layer):
    keys = iter(jax.random.split(key, 40))

    def lin(fan_in, fan_out):
        kw, kb = jax.random.split(next(keys))
        s = 1.0 / math.sqrt(fan_in)
        w = jax.random.uniform(kw, (fan_in, fan_out), jnp.float32, -s, s)
        b = jax.random.uniform(kb, (1, fan_out), jnp.float32, -s, s)
        return w, b

    def lin_stack(n, fan_in, fan_out):
        ws, bs = zip(*(lin(fan_in, fan_out) for _ in range(n)))
        return jnp.stack(ws), jnp.stack(bs)          # (L,in,out), (L,1,out)

    def bn_fold(dim):
        kg, kb, km, kv = jax.random.split(next(keys), 4)
        gamma = 1.0 + 0.1 * jax.random.normal(kg, (1, dim), jnp.float32)
        beta = 0.1 * jax.random.normal(kb, (1, dim), jnp.float32)
        mean = 0.1 * jax.random.normal(km, (1, dim), jnp.float32)
        var = jax.random.uniform(kv, (1, dim), jnp.float32, 0.5, 1.5)
        scale = gamma * jax.lax.rsqrt(var + 1e-5)
        return scale, beta - mean * scale

    p = {}
    p["w_pre"], p["b_pre"] = lin(din, h)          # Graph_Conv.fc_hidden (pre)
    p["w_fc1"], p["b_fc1"] = lin(din, h)          # Gated_Skip_Connection.fc_1
    p["w_pg1"], p["b_pg1"] = lin(h, h)            # gated_X1 (pre)
    p["w_pg2"], p["b_pg2"] = lin(h, h)            # gated_X2 (pre)
    p["wl_hid"], p["bl_hid"] = lin_stack(num_layer, h, h)
    p["wl_g1"], p["bl_g1"] = lin_stack(num_layer, h, h)
    p["wl_g2"], p["bl_g2"] = lin_stack(num_layer, h, h)
    p["w_ro"], p["b_ro"] = lin(h, h2)             # Readout.fc_hidden
    p["bn_ro_s"], p["bn_ro_b"] = bn_fold(h2)      # Readout.bn (eval, folded)
    p["w_h1"], p["b_h1"] = lin(h2, h2)
    p["bn1_s"], p["bn1_b"] = bn_fold(h2)          # GCN.batch_norm_1 (256)
    p["w_h2"], p["b_h2"] = lin(h2, h2)
    p["w_pred"], p["b_pred"] = lin(h2, 1)
    return p


# --------- prep: fuse gate weights, pack small vectors, cast to bf16 ----------
def prep_params(p):
    bf16 = jnp.bfloat16
    L = p["wl_hid"].shape[0]
    H2 = p["w_ro"].shape[1]

    wg_pre = jnp.concatenate([p["w_pg1"], p["w_pg2"]], axis=0)     # (2H, H)
    bg_pre = p["b_pg1"] + p["b_pg2"]                               # (1, H)
    wl_g = jnp.concatenate([p["wl_g1"], p["wl_g2"]], axis=1)       # (L, 2H, H)
    bl_g = p["bl_g1"] + p["bl_g2"]                                 # (L, 1, H)

    # packed H-wide vectors: [b_pre, b_fc1, bg_pre, bl_hid[0], bl_g[0], ...]
    rows_h = [p["b_pre"], p["b_fc1"], bg_pre]
    for l in range(L):
        rows_h.append(p["bl_hid"][l])
        rows_h.append(bl_g[l])
    vec_h = jnp.concatenate(rows_h, axis=0).astype(jnp.float32)    # (3+2L, H)

    # packed H2-wide vectors (b_pred padded into the last row, lane 0)
    b_pred_row = jnp.zeros((1, H2), jnp.float32).at[0, 0].set(p["b_pred"][0, 0])
    vec_h2 = jnp.concatenate(
        [p["b_ro"], p["bn_ro_s"], p["bn_ro_b"],
         p["b_h1"], p["bn1_s"], p["bn1_b"],
         p["b_h2"], b_pred_row], axis=0).astype(jnp.float32)       # (8, H2)

    return dict(
        w_pre=p["w_pre"].astype(bf16),
        w_fc1=p["w_fc1"].astype(bf16),
        wg_pre=wg_pre.astype(bf16),
        wl_hid=p["wl_hid"].astype(bf16),
        wl_g=wl_g.astype(bf16),
        w_ro=p["w_ro"].astype(bf16),
        w_h1=p["w_h1"].astype(bf16),
        w_h2=p["w_h2"].astype(bf16),
        w_pred=p["w_pred"].astype(bf16),
        vec_h=vec_h,
        vec_h2=vec_h2,
    )


# ------------------------- references (correctness) ---------------------------
def ref_forward_f32(x, A, p):
    """Exact module-order semantics, all f32."""
    def gated(x_in, x_new, w1, b1, w2, b2):
        g = jax.nn.sigmoid(x_in @ w1 + b1 + x_new @ w2 + b2)
        return x_new * g + x_in * (1.0 - g)

    xn = jnp.einsum("bij,bjd->bid", A, x) @ p["w_pre"] + p["b_pre"]
    xp = x @ p["w_fc1"] + p["b_fc1"]
    h = gated(xp, xn, p["w_pg1"], p["b_pg1"], p["w_pg2"], p["b_pg2"])
    for l in range(p["wl_hid"].shape[0]):
        xn = jnp.einsum("bij,bjd->bid", A, h) @ p["wl_hid"][l] + p["bl_hid"][l]
        h = gated(h, xn, p["wl_g1"][l], p["bl_g1"][l], p["wl_g2"][l], p["bl_g2"][l])
    r = h @ p["w_ro"] + p["b_ro"]
    s = jnp.sum(r, axis=1)
    s = jnp.maximum(s * p["bn_ro_s"] + p["bn_ro_b"], 0.0)
    h1 = (s @ p["w_h1"] + p["b_h1"]) * p["bn1_s"] + p["bn1_b"]
    h2 = h1 @ p["w_h2"] + p["b_h2"]
    return jax.nn.sigmoid(h2 @ p["w_pred"] + p["b_pred"])


def ref_forward_bf16(x, A, p):
    """Mirrors the kernel's numerics: bf16 matmul inputs, f32 accumulation,
    sum-before-linear readout. Used for the tight tolerance check."""
    bf16, f32 = jnp.bfloat16, jnp.float32
    N = x.shape[1]

    def mm(a, w):
        return jnp.dot(a.astype(bf16), w.astype(bf16), preferred_element_type=f32)

    def bmm(A_, x_):
        return jnp.einsum("gij,gjd->gid", A_.astype(bf16), x_.astype(bf16),
                          preferred_element_type=f32)

    def gated(x_in, x_new, w1, b1, w2, b2):
        g = jax.nn.sigmoid(mm(x_in, w1) + b1 + mm(x_new, w2) + b2)
        return x_new * g + x_in * (1.0 - g)

    xn = mm(bmm(A, x), p["w_pre"]) + p["b_pre"]
    xp = mm(x, p["w_fc1"]) + p["b_fc1"]
    h = gated(xp, xn, p["w_pg1"], p["b_pg1"], p["w_pg2"], p["b_pg2"])
    for l in range(p["wl_hid"].shape[0]):
        xn = mm(bmm(A, h), p["wl_hid"][l]) + p["bl_hid"][l]
        h = gated(h, xn, p["wl_g1"][l], p["bl_g1"][l], p["wl_g2"][l], p["bl_g2"][l])
    xs = jnp.sum(h, axis=1)
    s = mm(xs, p["w_ro"]) + float(N) * p["b_ro"]
    s = jnp.maximum(s * p["bn_ro_s"] + p["bn_ro_b"], 0.0)
    h1 = (mm(s, p["w_h1"]) + p["b_h1"]) * p["bn1_s"] + p["bn1_b"]
    h2 = mm(h1, p["w_h2"]) + p["b_h2"]
    return jax.nn.sigmoid(mm(h2, p["w_pred"]) + p["b_pred"])


# ------------------------------------ main ------------------------------------
if __name__ == "__main__":
    B, N, DIN, H, H2, L = 2, 16, 8, 32, 256, 2
    key = jax.random.PRNGKey(0)
    kx, ka, kp = jax.random.split(key, 3)
    x = jax.random.normal(kx, (B, N, DIN), jnp.float32)
    A = jax.random.uniform(ka, (B, N, N), jnp.float32)   # dense adjacency-like
    params = init_params(kp, DIN, H, H2, L)
    kparams = prep_params(params)

    y = jax.block_until_ready(gcn_forward(x, A, kparams))
    assert y.shape == (B, 1)

    # Tight check vs a reference mirroring the kernel's bf16/reassociation.
    y_mirror = ref_forward_bf16(x, A, params)
    assert jnp.allclose(y, y_mirror, atol=2e-3, rtol=2e-3)

    # Loose check vs the exact f32 module semantics (bound on bf16 drift).
    y_f32 = ref_forward_f32(x, A, params)
    assert jnp.allclose(y, y_f32, atol=5e-2, rtol=5e-2)

    print("KERNEL_OK")
</pallas_src>

<mosaic_0001>
module attributes {stable_mosaic.version = 11 : i64} {
  func.func @gcn_kernel(%arg0: i32, %arg1: memref<2x16x8xbf16, #tpu.memory_space<vmem>>, %arg2: memref<2x16x16xbf16, #tpu.memory_space<vmem>>, %arg3: memref<8x32xbf16, #tpu.memory_space<vmem>>, %arg4: memref<8x32xbf16, #tpu.memory_space<vmem>>, %arg5: memref<64x32xbf16, #tpu.memory_space<vmem>>, %arg6: memref<2x32x32xbf16, #tpu.memory_space<vmem>>, %arg7: memref<2x64x32xbf16, #tpu.memory_space<vmem>>, %arg8: memref<32x256xbf16, #tpu.memory_space<vmem>>, %arg9: memref<256x256xbf16, #tpu.memory_space<vmem>>, %arg10: memref<256x256xbf16, #tpu.memory_space<vmem>>, %arg11: memref<256x1xbf16, #tpu.memory_space<vmem>>, %arg12: memref<7x32xf32, #tpu.memory_space<vmem>>, %arg13: memref<8x256xf32, #tpu.memory_space<vmem>>, %arg14: memref<1x2x1xf32, #tpu.memory_space<vmem>>) attributes {dimension_semantics = [#tpu.dimension_semantics<parallel>], iteration_bounds = array<i64: 1>, scalar_prefetch = 0 : i64, scratch_operands = 0 : i64, tpu.core_type = #tpu.core_type<tc>, window_params = [{transform_indices = @transform_0, window_bounds = array<i64: 2, 16, 8>}, {transform_indices = @transform_1, window_bounds = array<i64: 2, 16, 16>}, {pipeline_mode = #tpu.pipeline_mode<synchronous>, transform_indices = @transform_2, window_bounds = array<i64: 8, 32>}, {pipeline_mode = #tpu.pipeline_mode<synchronous>, transform_indices = @transform_3, window_bounds = array<i64: 8, 32>}, {pipeline_mode = #tpu.pipeline_mode<synchronous>, transform_indices = @transform_4, window_bounds = array<i64: 64, 32>}, {pipeline_mode = #tpu.pipeline_mode<synchronous>, transform_indices = @transform_5, window_bounds = array<i64: 2, 32, 32>}, {pipeline_mode = #tpu.pipeline_mode<synchronous>, transform_indices = @transform_6, window_bounds = array<i64: 2, 64, 32>}, {pipeline_mode = #tpu.pipeline_mode<synchronous>, transform_indices = @transform_7, window_bounds = array<i64: 32, 256>}, {pipeline_mode = #tpu.pipeline_mode<synchronous>, transform_indices = @transform_8, window_bounds = array<i64: 256, 256>}, {pipeline_mode = #tpu.pipeline_mode<synchronous>, transform_indices = @transform_9, window_bounds = array<i64: 256, 256>}, {pipeline_mode = #tpu.pipeline_mode<synchronous>, transform_indices = @transform_10, window_bounds = array<i64: 256, 1>}, {pipeline_mode = #tpu.pipeline_mode<synchronous>, transform_indices = @transform_11, window_bounds = array<i64: 7, 32>}, {pipeline_mode = #tpu.pipeline_mode<synchronous>, transform_indices = @transform_12, window_bounds = array<i64: 8, 256>}, {transform_indices = @transform_13, window_bounds = array<i64: 1, 2, 1>}]} {
    %c0 = arith.constant 0 : index
    %c0_0 = arith.constant 0 : index
    %c0_1 = arith.constant 0 : index
    %0 = vector.load %arg1[%c0, %c0_0, %c0_1] : memref<2x16x8xbf16, #tpu.memory_space<vmem>>, vector<2x16x8xbf16>
    %c0_2 = arith.constant 0 : index
    %c0_3 = arith.constant 0 : index
    %c0_4 = arith.constant 0 : index
    %1 = vector.load %arg2[%c0_2, %c0_3, %c0_4] : memref<2x16x16xbf16, #tpu.memory_space<vmem>>, vector<2x16x16xbf16>
    "tpu.trace_start"() <{level = 10 : i32, message = "gij,gjd->gid"}> : () -> ()
    %cst = arith.constant dense<0.000000e+00> : vector<2x16x8xf32>
    %2 = tpu.matmul %1, %0, %cst {dimension_numbers = #tpu.dot_dimension_numbers<[2], [1], [1], [2], [0, 0, 0, 1, 1, 2], [0], [0]>} : vector<2x16x16xbf16>, vector<2x16x8xbf16>, vector<2x16x8xf32> -> vector<2x16x8xf32>
    "tpu.trace_stop"() : () -> ()
    %3 = vector.shape_cast %2 : vector<2x16x8xf32> to vector<32x8xf32>
    %4 = arith.truncf %3 : vector<32x8xf32> to vector<32x8xbf16>
    %c0_5 = arith.constant 0 : index
    %c0_6 = arith.constant 0 : index
    %5 = vector.load %arg3[%c0_5, %c0_6] : memref<8x32xbf16, #tpu.memory_space<vmem>>, vector<8x32xbf16>
    %cst_7 = arith.constant dense<0.000000e+00> : vector<32x32xf32>
    %6 = tpu.matmul %4, %5, %cst_7 {dimension_numbers = #tpu.dot_dimension_numbers<[1], [0], [0], [1], [0, 0, 1, 1], [], []>} : vector<32x8xbf16>, vector<8x32xbf16>, vector<32x32xf32> -> vector<32x32xf32>
    %c0_8 = arith.constant 0 : index
    %c0_9 = arith.constant 0 : index
    %7 = vector.load %arg12[%c0_8, %c0_9] : memref<7x32xf32, #tpu.memory_space<vmem>>, vector<1x32xf32>
    %8 = vector.broadcast %7 : vector<1x32xf32> to vector<32x32xf32>
    %9 = arith.addf %6, %8 : vector<32x32xf32>
    %10 = vector.shape_cast %0 : vector<2x16x8xbf16> to vector<32x8xbf16>
    %c0_10 = arith.constant 0 : index
    %c0_11 = arith.constant 0 : index
    %11 = vector.load %arg4[%c0_10, %c0_11] : memref<8x32xbf16, #tpu.memory_space<vmem>>, vector<8x32xbf16>
    %cst_12 = arith.constant dense<0.000000e+00> : vector<32x32xf32>
    %12 = tpu.matmul %10, %11, %cst_12 {dimension_numbers = #tpu.dot_dimension_numbers<[1], [0], [0], [1], [0, 0, 1, 1], [], []>} : vector<32x8xbf16>, vector<8x32xbf16>, vector<32x32xf32> -> vector<32x32xf32>
    %c1 = arith.constant 1 : index
    %c0_13 = arith.constant 0 : index
    %13 = vector.load %arg12[%c1, %c0_13] : memref<7x32xf32, #tpu.memory_space<vmem>>, vector<1x32xf32>
    %14 = vector.broadcast %13 : vector<1x32xf32> to vector<32x32xf32>
    %15 = arith.addf %12, %14 : vector<32x32xf32>
    %c0_14 = arith.constant 0 : index
    %c0_15 = arith.constant 0 : index
    %16 = vector.load %arg5[%c0_14, %c0_15] : memref<64x32xbf16, #tpu.memory_space<vmem>>, vector<64x32xbf16>
    %c2 = arith.constant 2 : index
    %c0_16 = arith.constant 0 : index
    %17 = vector.load %arg12[%c2, %c0_16] : memref<7x32xf32, #tpu.memory_space<vmem>>, vector<1x32xf32>
    %18 = arith.truncf %15 : vector<32x32xf32> to vector<32x32xbf16>
    %19 = arith.truncf %9 : vector<32x32xf32> to vector<32x32xbf16>
    %20 = tpu.concatenate %18, %19 in 1 : vector<32x32xbf16>, vector<32x32xbf16> -> vector<32x64xbf16>
    %cst_17 = arith.constant dense<0.000000e+00> : vector<32x32xf32>
    %21 = tpu.matmul %20, %16, %cst_17 {dimension_numbers = #tpu.dot_dimension_numbers<[1], [0], [0], [1], [0, 0, 1, 1], [], []>} : vector<32x64xbf16>, vector<64x32xbf16>, vector<32x32xf32> -> vector<32x32xf32>
    %22 = vector.broadcast %17 : vector<1x32xf32> to vector<32x32xf32>
    %23 = arith.addf %21, %22 : vector<32x32xf32>
    %24 = arith.negf %23 : vector<32x32xf32>
    %25 = math.exp %24 : vector<32x32xf32>
    %cst_18 = arith.constant 1.000000e+00 : f32
    %26 = vector.broadcast %cst_18 : f32 to vector<32x32xf32>
    %27 = arith.addf %26, %25 : vector<32x32xf32>
    %28 = arith.divf %26, %27 : vector<32x32xf32>
    %29 = arith.mulf %9, %28 : vector<32x32xf32>
    %cst_19 = arith.constant 1.000000e+00 : f32
    %30 = vector.broadcast %cst_19 : f32 to vector<32x32xf32>
    %31 = arith.subf %30, %28 : vector<32x32xf32>
    %32 = arith.mulf %15, %31 : vector<32x32xf32>
    %33 = arith.addf %29, %32 : vector<32x32xf32>
    %34 = arith.truncf %33 : vector<32x32xf32> to vector<32x32xbf16>
    %35 = vector.shape_cast %34 : vector<32x32xbf16> to vector<2x16x32xbf16>
    "tpu.trace_start"() <{level = 10 : i32, message = "gij,gjd->gid"}> : () -> ()
    %cst_20 = arith.constant dense<0.000000e+00> : vector<2x16x32xf32>
    %36 = tpu.matmul %1, %35, %cst_20 {dimension_numbers = #tpu.dot_dimension_numbers<[2], [1], [1], [2], [0, 0, 0, 1, 1, 2], [0], [0]>} : vector<2x16x16xbf16>, vector<2x16x32xbf16>, vector<2x16x32xf32> -> vector<2x16x32xf32>
    "tpu.trace_stop"() : () -> ()
    %37 = vector.shape_cast %36 : vector<2x16x32xf32> to vector<32x32xf32>
    %38 = arith.truncf %37 : vector<32x32xf32> to vector<32x32xbf16>
    %c0_21 = arith.constant 0 : index
    %c0_22 = arith.constant 0 : index
    %c0_23 = arith.constant 0 : index
    %39 = vector.load %arg6[%c0_21, %c0_22, %c0_23] : memref<2x32x32xbf16, #tpu.memory_space<vmem>>, vector<1x32x32xbf16>
    %40 = vector.shape_cast %39 : vector<1x32x32xbf16> to vector<32x32xbf16>
    %cst_24 = arith.constant dense<0.000000e+00> : vector<32x32xf32>
    %41 = tpu.matmul %38, %40, %cst_24 {dimension_numbers = #tpu.dot_dimension_numbers<[1], [0], [0], [1], [0, 0, 1, 1], [], []>} : vector<32x32xbf16>, vector<32x32xbf16>, vector<32x32xf32> -> vector<32x32xf32>
    %c3 = arith.constant 3 : index
    %c0_25 = arith.constant 0 : index
    %42 = vector.load %arg12[%c3, %c0_25] : memref<7x32xf32, #tpu.memory_space<vmem>>, vector<1x32xf32>
    %43 = vector.broadcast %42 : vector<1x32xf32> to vector<32x32xf32>
    %44 = arith.addf %41, %43 : vector<32x32xf32>
    %c0_26 = arith.constant 0 : index
    %c0_27 = arith.constant 0 : index
    %c0_28 = arith.constant 0 : index
    %45 = vector.load %arg7[%c0_26, %c0_27, %c0_28] : memref<2x64x32xbf16, #tpu.memory_space<vmem>>, vector<1x64x32xbf16>
    %46 = vector.shape_cast %45 : vector<1x64x32xbf16> to vector<64x32xbf16>
    %c4 = arith.constant 4 : index
    %c0_29 = arith.constant 0 : index
    %47 = vector.load %arg12[%c4, %c0_29] : memref<7x32xf32, #tpu.memory_space<vmem>>, vector<1x32xf32>
    %48 = arith.truncf %33 : vector<32x32xf32> to vector<32x32xbf16>
    %49 = arith.truncf %44 : vector<32x32xf32> to vector<32x32xbf16>
    %50 = tpu.concatenate %48, %49 in 1 : vector<32x32xbf16>, vector<32x32xbf16> -> vector<32x64xbf16>
    %cst_30 = arith.constant dense<0.000000e+00> : vector<32x32xf32>
    %51 = tpu.matmul %50, %46, %cst_30 {dimension_numbers = #tpu.dot_dimension_numbers<[1], [0], [0], [1], [0, 0, 1, 1], [], []>} : vector<32x64xbf16>, vector<64x32xbf16>, vector<32x32xf32> -> vector<32x32xf32>
    %52 = vector.broadcast %47 : vector<1x32xf32> to vector<32x32xf32>
    %53 = arith.addf %51, %52 : vector<32x32xf32>
    %54 = arith.negf %53 : vector<32x32xf32>
    %55 = math.exp %54 : vector<32x32xf32>
    %cst_31 = arith.constant 1.000000e+00 : f32
    %56 = vector.broadcast %cst_31 : f32 to vector<32x32xf32>
    %57 = arith.addf %56, %55 : vector<32x32xf32>
    %58 = arith.divf %56, %57 : vector<32x32xf32>
    %59 = arith.mulf %44, %58 : vector<32x32xf32>
    %cst_32 = arith.constant 1.000000e+00 : f32
    %60 = vector.broadcast %cst_32 : f32 to vector<32x32xf32>
    %61 = arith.subf %60, %58 : vector<32x32xf32>
    %62 = arith.mulf %33, %61 : vector<32x32xf32>
    %63 = arith.addf %59, %62 : vector<32x32xf32>
    %64 = arith.truncf %63 : vector<32x32xf32> to vector<32x32xbf16>
    %65 = vector.shape_cast %64 : vector<32x32xbf16> to vector<2x16x32xbf16>
    "tpu.trace_start"() <{level = 10 : i32, message = "gij,gjd->gid"}> : () -> ()
    %cst_33 = arith.constant dense<0.000000e+00> : vector<2x16x32xf32>
    %66 = tpu.matmul %1, %65, %cst_33 {dimension_numbers = #tpu.dot_dimension_numbers<[2], [1], [1], [2], [0, 0, 0, 1, 1, 2], [0], [0]>} : vector<2x16x16xbf16>, vector<2x16x32xbf16>, vector<2x16x32xf32> -> vector<2x16x32xf32>
    "tpu.trace_stop"() : () -> ()
    %67 = vector.shape_cast %66 : vector<2x16x32xf32> to vector<32x32xf32>
    %68 = arith.truncf %67 : vector<32x32xf32> to vector<32x32xbf16>
    %c1_34 = arith.constant 1 : index
    %c0_35 = arith.constant 0 : index
    %c0_36 = arith.constant 0 : index
    %69 = vector.load %arg6[%c1_34, %c0_35, %c0_36] : memref<2x32x32xbf16, #tpu.memory_space<vmem>>, vector<1x32x32xbf16>
    %70 = vector.shape_cast %69 : vector<1x32x32xbf16> to vector<32x32xbf16>
    %cst_37 = arith.constant dense<0.000000e+00> : vector<32x32xf32>
    %71 = tpu.matmul %68, %70, %cst_37 {dimension_numbers = #tpu.dot_dimension_numbers<[1], [0], [0], [1], [0, 0, 1, 1], [], []>} : vector<32x32xbf16>, vector<32x32xbf16>, vector<32x32xf32> -> vector<32x32xf32>
    %c5 = arith.constant 5 : index
    %c0_38 = arith.constant 0 : index
    %72 = vector.load %arg12[%c5, %c0_38] : memref<7x32xf32, #tpu.memory_space<vmem>>, vector<1x32xf32>
    %73 = vector.broadcast %72 : vector<1x32xf32> to vector<32x32xf32>
    %74 = arith.addf %71, %73 : vector<32x32xf32>
    %c1_39 = arith.constant 1 : index
    %c0_40 = arith.constant 0 : index
    %c0_41 = arith.constant 0 : index
    %75 = vector.load %arg7[%c1_39, %c0_40, %c0_41] : memref<2x64x32xbf16, #tpu.memory_space<vmem>>, vector<1x64x32xbf16>
    %76 = vector.shape_cast %75 : vector<1x64x32xbf16> to vector<64x32xbf16>
    %c6 = arith.constant 6 : index
    %c0_42 = arith.constant 0 : index
    %77 = vector.load %arg12[%c6, %c0_42] : memref<7x32xf32, #tpu.memory_space<vmem>>, vector<1x32xf32>
    %78 = arith.truncf %63 : vector<32x32xf32> to vector<32x32xbf16>
    %79 = arith.truncf %74 : vector<32x32xf32> to vector<32x32xbf16>
    %80 = tpu.concatenate %78, %79 in 1 : vector<32x32xbf16>, vector<32x32xbf16> -> vector<32x64xbf16>
    %cst_43 = arith.constant dense<0.000000e+00> : vector<32x32xf32>
    %81 = tpu.matmul %80, %76, %cst_43 {dimension_numbers = #tpu.dot_dimension_numbers<[1], [0], [0], [1], [0, 0, 1, 1], [], []>} : vector<32x64xbf16>, vector<64x32xbf16>, vector<32x32xf32> -> vector<32x32xf32>
    %82 = vector.broadcast %77 : vector<1x32xf32> to vector<32x32xf32>
    %83 = arith.addf %81, %82 : vector<32x32xf32>
    %84 = arith.negf %83 : vector<32x32xf32>
    %85 = math.exp %84 : vector<32x32xf32>
    %cst_44 = arith.constant 1.000000e+00 : f32
    %86 = vector.broadcast %cst_44 : f32 to vector<32x32xf32>
    %87 = arith.addf %86, %85 : vector<32x32xf32>
    %88 = arith.divf %86, %87 : vector<32x32xf32>
    %89 = arith.mulf %74, %88 : vector<32x32xf32>
    %cst_45 = arith.constant 1.000000e+00 : f32
    %90 = vector.broadcast %cst_45 : f32 to vector<32x32xf32>
    %91 = arith.subf %90, %88 : vector<32x32xf32>
    %92 = arith.mulf %63, %91 : vector<32x32xf32>
    %93 = arith.addf %89, %92 : vector<32x32xf32>
    %94 = vector.shape_cast %93 : vector<32x32xf32> to vector<2x16x32xf32>
    %cst_46 = arith.constant dense<0.000000e+00> : vector<2x32xf32>
    %95 = vector.multi_reduction <add>, %94, %cst_46 [1] : vector<2x16x32xf32> to vector<2x32xf32>
    %96 = arith.truncf %95 : vector<2x32xf32> to vector<2x32xbf16>
    %c0_47 = arith.constant 0 : index
    %c0_48 = arith.constant 0 : index
    %97 = vector.load %arg8[%c0_47, %c0_48] : memref<32x256xbf16, #tpu.memory_space<vmem>>, vector<32x256xbf16>
    %cst_49 = arith.constant dense<0.000000e+00> : vector<2x256xf32>
    %98 = tpu.matmul %96, %97, %cst_49 {dimension_numbers = #tpu.dot_dimension_numbers<[1], [0], [0], [1], [0, 0, 1, 1], [], []>} : vector<2x32xbf16>, vector<32x256xbf16>, vector<2x256xf32> -> vector<2x256xf32>
    %c0_50 = arith.constant 0 : index
    %c0_51 = arith.constant 0 : index
    %99 = vector.load %arg13[%c0_50, %c0_51] : memref<8x256xf32, #tpu.memory_space<vmem>>, vector<1x256xf32>
    %cst_52 = arith.constant 1.600000e+01 : f32
    %100 = vector.broadcast %cst_52 : f32 to vector<1x256xf32>
    %101 = arith.mulf %100, %99 : vector<1x256xf32>
    %102 = vector.broadcast %101 : vector<1x256xf32> to vector<2x256xf32>
    %103 = arith.addf %98, %102 : vector<2x256xf32>
    %c1_53 = arith.constant 1 : index
    %c0_54 = arith.constant 0 : index
    %104 = vector.load %arg13[%c1_53, %c0_54] : memref<8x256xf32, #tpu.memory_space<vmem>>, vector<1x256xf32>
    %105 = vector.broadcast %104 : vector<1x256xf32> to vector<2x256xf32>
    %106 = arith.mulf %103, %105 : vector<2x256xf32>
    %c2_55 = arith.constant 2 : index
    %c0_56 = arith.constant 0 : index
    %107 = vector.load %arg13[%c2_55, %c0_56] : memref<8x256xf32, #tpu.memory_space<vmem>>, vector<1x256xf32>
    %108 = vector.broadcast %107 : vector<1x256xf32> to vector<2x256xf32>
    %109 = arith.addf %106, %108 : vector<2x256xf32>
    %cst_57 = arith.constant 0.000000e+00 : f32
    %110 = vector.broadcast %cst_57 : f32 to vector<2x256xf32>
    %111 = arith.maximumf %109, %110 : vector<2x256xf32>
    %112 = arith.truncf %111 : vector<2x256xf32> to vector<2x256xbf16>
    %c0_58 = arith.constant 0 : index
    %c0_59 = arith.constant 0 : index
    %113 = vector.load %arg9[%c0_58, %c0_59] : memref<256x256xbf16, #tpu.memory_space<vmem>>, vector<256x256xbf16>
    %cst_60 = arith.constant dense<0.000000e+00> : vector<2x256xf32>
    %114 = tpu.matmul %112, %113, %cst_60 {dimension_numbers = #tpu.dot_dimension_numbers<[1], [0], [0], [1], [0, 0, 1, 1], [], []>} : vector<2x256xbf16>, vector<256x256xbf16>, vector<2x256xf32> -> vector<2x256xf32>
    %c3_61 = arith.constant 3 : index
    %c0_62 = arith.constant 0 : index
    %115 = vector.load %arg13[%c3_61, %c0_62] : memref<8x256xf32, #tpu.memory_space<vmem>>, vector<1x256xf32>
    %116 = vector.broadcast %115 : vector<1x256xf32> to vector<2x256xf32>
    %117 = arith.addf %114, %116 : vector<2x256xf32>
    %c4_63 = arith.constant 4 : index
    %c0_64 = arith.constant 0 : index
    %118 = vector.load %arg13[%c4_63, %c0_64] : memref<8x256xf32, #tpu.memory_space<vmem>>, vector<1x256xf32>
    %119 = vector.broadcast %118 : vector<1x256xf32> to vector<2x256xf32>
    %120 = arith.mulf %117, %119 : vector<2x256xf32>
    %c5_65 = arith.constant 5 : index
    %c0_66 = arith.constant 0 : index
    %121 = vector.load %arg13[%c5_65, %c0_66] : memref<8x256xf32, #tpu.memory_space<vmem>>, vector<1x256xf32>
    %122 = vector.broadcast %121 : vector<1x256xf32> to vector<2x256xf32>
    %123 = arith.addf %120, %122 : vector<2x256xf32>
    %124 = arith.truncf %123 : vector<2x256xf32> to vector<2x256xbf16>
    %c0_67 = arith.constant 0 : index
    %c0_68 = arith.constant 0 : index
    %125 = vector.load %arg10[%c0_67, %c0_68] : memref<256x256xbf16, #tpu.memory_space<vmem>>, vector<256x256xbf16>
    %cst_69 = arith.constant dense<0.000000e+00> : vector<2x256xf32>
    %126 = tpu.matmul %124, %125, %cst_69 {dimension_numbers = #tpu.dot_dimension_numbers<[1], [0], [0], [1], [0, 0, 1, 1], [], []>} : vector<2x256xbf16>, vector<256x256xbf16>, vector<2x256xf32> -> vector<2x256xf32>
    %c6_70 = arith.constant 6 : index
    %c0_71 = arith.constant 0 : index
    %127 = vector.load %arg13[%c6_70, %c0_71] : memref<8x256xf32, #tpu.memory_space<vmem>>, vector<1x256xf32>
    %128 = vector.broadcast %127 : vector<1x256xf32> to vector<2x256xf32>
    %129 = arith.addf %126, %128 : vector<2x256xf32>
    %130 = arith.truncf %129 : vector<2x256xf32> to vector<2x256xbf16>
    %c0_72 = arith.constant 0 : index
    %c0_73 = arith.constant 0 : index
    %131 = vector.load %arg11[%c0_72, %c0_73] : memref<256x1xbf16, #tpu.memory_space<vmem>>, vector<256x1xbf16>
    %cst_74 = arith.constant dense<0.000000e+00> : vector<2x1xf32>
    %132 = tpu.matmul %130, %131, %cst_74 {dimension_numbers = #tpu.dot_dimension_numbers<[1], [0], [0], [1], [0, 0, 1, 1], [], []>} : vector<2x256xbf16>, vector<256x1xbf16>, vector<2x1xf32> -> vector<2x1xf32>
    %c7 = arith.constant 7 : index
    %c0_75 = arith.constant 0 : index
    %133 = vector.load %arg13[%c7, %c0_75] : memref<8x256xf32, #tpu.memory_space<vmem>>, vector<1x1xf32>
    %134 = vector.broadcast %133 : vector<1x1xf32> to vector<2x1xf32>
    %135 = arith.addf %132, %134 : vector<2x1xf32>
    %136 = arith.negf %135 : vector<2x1xf32>
    %137 = math.exp %136 : vector<2x1xf32>
    %cst_76 = arith.constant 1.000000e+00 : f32
    %138 = vector.broadcast %cst_76 : f32 to vector<2x1xf32>
    %139 = arith.addf %138, %137 : vector<2x1xf32>
    %140 = arith.divf %138, %139 : vector<2x1xf32>
    %c0_77 = arith.constant 0 : index
    %c0_78 = arith.constant 0 : index
    %c0_79 = arith.constant 0 : index
    %141 = vector.load %arg14[%c0_77, %c0_78, %c0_79] : memref<1x2x1xf32, #tpu.memory_space<vmem>>, vector<1x2x1xf32>
    %142 = vector.shape_cast %141 : vector<1x2x1xf32> to vector<2x1xf32>
    %143 = vector.shape_cast %140 : vector<2x1xf32> to vector<1x2x1xf32>
    tpu.vector_store %arg14[%c0_77, %c0_78, %c0_79], %143 {strides = array<i32>} : memref<1x2x1xf32, #tpu.memory_space<vmem>>, vector<1x2x1xf32>,
    return
  }
  func.func @transform_0(%arg0: i32) -> (i32, i32, i32) {
    %c0_i32 = arith.constant 0 : i32
    %c0_i32_0 = arith.constant 0 : i32
    %c0_i32_1 = arith.constant 0 : i32
    return %arg0, %c0_i32, %c0_i32_0 : i32, i32, i32
  }
  func.func @transform_1(%arg0: i32) -> (i32, i32, i32) {
    %c0_i32 = arith.constant 0 : i32
    %c0_i32_0 = arith.constant 0 : i32
    %c0_i32_1 = arith.constant 0 : i32
    return %arg0, %c0_i32, %c0_i32_0 : i32, i32, i32
  }
  func.func @transform_2(%arg0: i32) -> (i32, i32) {
    %c0_i32 = arith.constant 0 : i32
    %c0_i32_0 = arith.constant 0 : i32
    %c0_i32_1 = arith.constant 0 : i32
    return %c0_i32, %c0_i32_0 : i32, i32
  }
  func.func @transform_3(%arg0: i32) -> (i32, i32) {
    %c0_i32 = arith.constant 0 : i32
    %c0_i32_0 = arith.constant 0 : i32
    %c0_i32_1 = arith.constant 0 : i32
    return %c0_i32, %c0_i32_0 : i32, i32
  }
  func.func @transform_4(%arg0: i32) -> (i32, i32) {
    %c0_i32 = arith.constant 0 : i32
    %c0_i32_0 = arith.constant 0 : i32
    %c0_i32_1 = arith.constant 0 : i32
    return %c0_i32, %c0_i32_0 : i32, i32
  }
  func.func @transform_5(%arg0: i32) -> (i32, i32, i32) {
    %c0_i32 = arith.constant 0 : i32
    %c0_i32_0 = arith.constant 0 : i32
    %c0_i32_1 = arith.constant 0 : i32
    %c0_i32_2 = arith.constant 0 : i32
    return %c0_i32, %c0_i32_0, %c0_i32_1 : i32, i32, i32
  }
  func.func @transform_6(%arg0: i32) -> (i32, i32, i32) {
    %c0_i32 = arith.constant 0 : i32
    %c0_i32_0 = arith.constant 0 : i32
    %c0_i32_1 = arith.constant 0 : i32
    %c0_i32_2 = arith.constant 0 : i32
    return %c0_i32, %c0_i32_0, %c0_i32_1 : i32, i32, i32
  }
  func.func @transform_7(%arg0: i32) -> (i32, i32) {
    %c0_i32 = arith.constant 0 : i32
    %c0_i32_0 = arith.constant 0 : i32
    %c0_i32_1 = arith.constant 0 : i32
    return %c0_i32, %c0_i32_0 : i32, i32
  }
  func.func @transform_8(%arg0: i32) -> (i32, i32) {
    %c0_i32 = arith.constant 0 : i32
    %c0_i32_0 = arith.constant 0 : i32
    %c0_i32_1 = arith.constant 0 : i32
    return %c0_i32, %c0_i32_0 : i32, i32
  }
  func.func @transform_9(%arg0: i32) -> (i32, i32) {
    %c0_i32 = arith.constant 0 : i32
    %c0_i32_0 = arith.constant 0 : i32
    %c0_i32_1 = arith.constant 0 : i32
    return %c0_i32, %c0_i32_0 : i32, i32
  }
  func.func @transform_10(%arg0: i32) -> (i32, i32) {
    %c0_i32 = arith.constant 0 : i32
    %c0_i32_0 = arith.constant 0 : i32
    %c0_i32_1 = arith.constant 0 : i32
    return %c0_i32, %c0_i32_0 : i32, i32
  }
  func.func @transform_11(%arg0: i32) -> (i32, i32) {
    %c0_i32 = arith.constant 0 : i32
    %c0_i32_0 = arith.constant 0 : i32
    %c0_i32_1 = arith.constant 0 : i32
    return %c0_i32, %c0_i32_0 : i32, i32
  }
  func.func @transform_12(%arg0: i32) -> (i32, i32) {
    %c0_i32 = arith.constant 0 : i32
    %c0_i32_0 = arith.constant 0 : i32
    %c0_i32_1 = arith.constant 0 : i32
    return %c0_i32, %c0_i32_0 : i32, i32
  }
  func.func @transform_13(%arg0: i32) -> (i32, i32, i32) {
    %c0_i32 = arith.constant 0 : i32
    %c0_i32_0 = arith.constant 0 : i32
    %c0_i32_1 = arith.constant 0 : i32
    return %arg0, %c0_i32, %c0_i32_0 : i32, i32, i32
  }
}

</mosaic_0001>

<bundles_post_ra>
// kernel: tpu_custom_call.1
= control target key start
LH: loop header
LB: loop body
LE: loop exit
PB: predicated region body
PF: predicated region fallthrough
CT: control target
= control target key end

     0   :  { %18 = vsyncpa [#allocation3], 0  ;;  %s3140_s0 = inlined_call_operand.vmem [shape: bf16[2,16,8], index: 0, kind: input, shape index: {}]   ;;  %s3141_s1 = inlined_call_operand.hbm [shape: bf16[2,16,16], index: 1, kind: input, shape index: {}]   ;;  %s3142_s2 = inlined_call_operand.hbm [shape: bf16[8,32], index: 2, kind: input, shape index: {}]   ;;  %s3143_s3 = inlined_call_operand.hbm [shape: bf16[8,32], index: 3, kind: input, shape index: {}]   ;;  %s3144_s4 = inlined_call_operand.vmem [shape: bf16[64,32], index: 4, kind: input, shape index: {}]   ;;  %s3145_s5 = inlined_call_operand.vmem [shape: bf16[2,32,32], index: 5, kind: input, shape index: {}]   ;;  %s3146_s6 = inlined_call_operand.vmem [shape: bf16[2,64,32], index: 6, kind: input, shape index: {}]   ;;  %s3147_s7 = inlined_call_operand.vmem [shape: bf16[32,256], index: 7, kind: input, shape index: {}]   ;;  %s3148_s8 = inlined_call_operand.vmem [shape: bf16[256,256], index: 8, kind: input, shape index: {}]   ;;  %s3149_s9 = inlined_call_operand.hbm [shape: bf16[256,256], index: 9, kind: input, shape index: {}]   ;;  %s3150_s10 = inlined_call_operand.vmem [shape: bf16[256,1], index: 10, kind: input, shape index: {}]   ;;  %s3151_s11 = inlined_call_operand.hbm [shape: f32[7,32], index: 11, kind: input, shape index: {}]   ;;  %s3152_s12 = inlined_call_operand.vmem [shape: f32[8,256], index: 12, kind: input, shape index: {}]   ;;  %s3153_s13 = inlined_call_operand.vmem [shape: f32[1,2,1], index: 13, kind: output, shape index: {}]  }
   0x1   :  { %19 = vsyncpa [#allocation5], 0 }
   0x2   :  { %20 = vsyncpa [#allocation8], 0  ;;  %s2622_s25 = smov [#allocation4]   ;;  %s2623_s27 = smov [#allocation7]  }
   0x3   :  { %s41_s26 = sshll.u32 %s2622_s25, 4  ;;  %s70_s28 = sshll.u32 %s2623_s27, 4  ;;  %s42_s26 = int_to_ptr.vmem [resolvable:$true] %s41_s26  ;;  %s2705_s28 = int_to_ptr.vmem [resolvable:$true] %s70_s28 }
   0x4   :  { %s2506_s14 = scalar_lea.hbm %s3142_s2, 64 }
   0x5   :  { %p2507_p0 = scmp.ne.s32.totalorder %s3142_s2, %s2506_s14  ;;  %p2510_p1 = scmp.lt.u32.totalorder %s2506_s14, %s3142_s2 }
   0x7   :  { %p2512_p2 = pnand %p2510_p1, %p2507_p0 }
   0x9   :  { %2515 = shalt.err (!%p2512_p2)
}
   0xa   :  { %s2516_s19 = scalar_lea.vmem %s42_s26, 64  ;;  %p2521_p4 = scmp.lt.s32.totalorder %s42_s26, %s42_s26 }
   0xb   :  { %p2517_p3 = scmp.ne.s32.totalorder %s42_s26, %s2516_s19  ;;  %p2522_p5 = scmp.lt.s32.totalorder %s2516_s19, %s2516_s19 }
   0xd   :  { %p2523_p6 = por %p2522_p5, %p2521_p4 }
   0xf   :  { %p2524_p7 = pnand %p2523_p6, %p2517_p3 }
  0x11   :  { %2527 = shalt.err (!%p2524_p7)
}
  0x12   :  { %44 = dma.hbm_to_vmem [thread:$0]  %s3142_s2, 64, %s42_s26, [#allocation5]  }
  0x13   :  { %s2528_s24 = scalar_lea.hbm %s3149_s9, 4096 }
  0x14   :  { %p2529_p8 = scmp.ne.s32.totalorder %s3149_s9, %s2528_s24  ;;  %p2532_p9 = scmp.lt.u32.totalorder %s2528_s24, %s3149_s9 }
  0x16   :  { %p2534_p10 = pnand %p2532_p9, %p2529_p8 }
  0x18   :  { %2537 = shalt.err (!%p2534_p10)
}
  0x19   :  { %s2538_s14 = scalar_lea.vmem %s2705_s28, 4096  ;;  %p2543_p12 = scmp.lt.s32.totalorder %s2705_s28, %s2705_s28 }
  0x1a   :  { %p2539_p11 = scmp.ne.s32.totalorder %s2705_s28, %s2538_s14  ;;  %p2544_p13 = scmp.lt.s32.totalorder %s2538_s14, %s2538_s14 }
  0x1c   :  { %p2545_p0 = por %p2544_p13, %p2543_p12 }
  0x1e   :  { %p2546_p1 = pnand %p2545_p0, %p2539_p11 }
  0x20   :  { %2549 = shalt.err (!%p2546_p1)
}
  0x21   :  { %s2624_s2 = smov 128   ;;  %s2625_s26 = smov 8  }
  0x22   :  { %76 = dma.hbm_to_vmem [thread:$0]  %s3149_s9, 4096, %s2705_s28, [#allocation8], %s2624_s2, %s2624_s2, %s2625_s26  }
  0x23   :  { %s2626_s17 = smov [#allocation2]   ;;  %s2550_s21 = scalar_lea.hbm %s3141_s1, 256 }
  0x24   :  { %s28_s18 = sshll.u32 %s2626_s17, 4  ;;  %p2551_p2 = scmp.ne.s32.totalorder %s3141_s1, %s2550_s21  ;;  %s29_s18 = int_to_ptr.vmem [resolvable:$true] %s28_s18 }
  0x25   :  { %p2554_p3 = scmp.lt.u32.totalorder %s2550_s21, %s3141_s1 }
  0x27   :  { %p2556_p4 = pnand %p2554_p3, %p2551_p2 }
  0x29   :  { %2559 = shalt.err (!%p2556_p4)
}
  0x2a   :  { %s2560_s27 = scalar_lea.vmem %s29_s18, 256  ;;  %p2565_p6 = scmp.lt.s32.totalorder %s29_s18, %s29_s18 }
  0x2b   :  { %p2561_p5 = scmp.ne.s32.totalorder %s29_s18, %s2560_s27  ;;  %p2566_p7 = scmp.lt.s32.totalorder %s2560_s27, %s2560_s27 }
  0x2d   :  { %p2567_p8 = por %p2566_p7, %p2565_p6 }
  0x2f   :  { %p2568_p9 = pnand %p2567_p8, %p2561_p5 }
  0x31   :  { %2571 = shalt.err (!%p2568_p9)
}
  0x32   :  { %s2627_s9 = smov 64   ;;  %s2628_s28 = smov 4  }
  0x33   :  { %34 = dma.hbm_to_vmem [thread:$0]  %s3141_s1, 256, %s29_s18, [#allocation3], %s2627_s9, %s2627_s9, %s2628_s28  }
  0x34   :  { %s2629_s14 = smov [#allocation6]   ;;  %s2630_s26 = smov [#allocation9]  }
  0x35   :  { %s51_s2 = sshll.u32 %s2629_s14, 4  ;;  %s85_s15 = sshll.u32 %s2630_s26, 4  ;;  %s52_s2 = int_to_ptr.vmem [resolvable:$true] %s51_s2  ;;  %s86_s15 = int_to_ptr.vmem [resolvable:$true] %s85_s15 }
  0x36   :  { %s2572_s19 = scalar_lea.hbm %s3143_s3, 64 }
  0x37   :  { %p2573_p10 = scmp.ne.s32.totalorder %s3143_s3, %s2572_s19  ;;  %p2576_p11 = scmp.lt.u32.totalorder %s2572_s19, %s3143_s3 }
  0x39   :  { %p2578_p12 = pnand %p2576_p11, %p2573_p10 }
  0x3b   :  { %2581 = shalt.err (!%p2578_p12)
}
  0x3c   :  { %s2582_s1 = scalar_lea.vmem %s52_s2, 64  ;;  %p2587_p0 = scmp.lt.s32.totalorder %s52_s2, %s52_s2 }
  0x3d   :  { %p2583_p13 = scmp.ne.s32.totalorder %s52_s2, %s2582_s1  ;;  %p2588_p1 = scmp.lt.s32.totalorder %s2582_s1, %s2582_s1 }
  0x3f   :  { %p2589_p2 = por %p2588_p1, %p2587_p0 }
  0x41   :  { %p2590_p3 = pnand %p2589_p2, %p2583_p13 }
  0x43   :  { %2593 = shalt.err (!%p2590_p3)
}
  0x44   :  { %54 = dma.hbm_to_vmem [thread:$0]  %s3143_s3, 64, %s52_s2, [#allocation5]  }
  0x45   :  { %s2594_s9 = scalar_lea.hbm %s3151_s11, 128 }
  0x46   :  { %p2595_p4 = scmp.ne.s32.totalorder %s3151_s11, %s2594_s9  ;;  %p2598_p5 = scmp.lt.u32.totalorder %s2594_s9, %s3151_s11 }
  0x48   :  { %p2600_p6 = pnand %p2598_p5, %p2595_p4 }
  0x4a   :  { %2603 = shalt.err (!%p2600_p6)
}
  0x4b   :  { %s2604_s26 = scalar_lea.vmem %s86_s15, 128  ;;  %p2609_p8 = scmp.lt.s32.totalorder %s86_s15, %s86_s15 }
  0x4c   :  { %p2605_p7 = scmp.ne.s32.totalorder %s86_s15, %s2604_s26  ;;  %p2610_p9 = scmp.lt.s32.totalorder %s2604_s26, %s2604_s26 }
  0x4e   :  { %p2611_p10 = por %p2610_p9, %p2609_p8 }
  0x50   :  { %p2612_p11 = pnand %p2611_p10, %p2605_p7 }
  0x52   :  { %2615 = shalt.err (!%p2612_p11)
}
  0x53   :  { %88 = dma.hbm_to_vmem [thread:$0]  %s3151_s11, 128, %s86_s15, [#allocation8]  }
  0x54   :  { %2616 = dma.done.wait [#allocation3], 256  }
  0x55   :  { %2617 = vsyncadd [#allocation3], 4294967040 }
  0x56   :  { %2618 = dma.done.wait [#allocation5], 128  }
  0x57   :  { %2619 = vsyncadd [#allocation5], 4294967168 }
  0x58   :  { %2620 = dma.done.wait [#allocation8], 4224  }
  0x59   :  { %2621 = vsyncadd [#allocation8], 4294963072  ;;  %v2631_v0 = vmov 0.0   ;;  %vm2632_vm0 = vmmov 0   ;;  %v2316_v1 = vld [vmem:[%s3140_s0] sm:$0xff]   ;;  %v2778_v2 = vld [vmem:[#allocation2] sm:$0xff]  }
  0x5a   :  { %2201 = vmatprep.subr.bf16.mxu0 %v2631_v0  ;;  %2203 = vmatprep.mubr.msk.bf16.mxu0 %vm2632_vm0, %v2631_v0  ;;  %vm126_vm1 = vcmask 130048   ;;  %v2318_v3 = vld [vmem:[%s3140_s0 + $0x8] sm:$0xff]   ;;  %v2788_v4 = vld [vmem:[#allocation2 + $0x8] sm:$0xff]   ;;  %vm234_vm2 = vcmask 64512   ;;  %v228_v5 = vld [vmem:[#allocation4] sm:$0xf] }
  0x5b   :  { %2202 = vmatpush3.bf16.msra.mxu0 %v2316_v1  ;;  %2221 = vmatprep.mubr.msk.bf16.mxu1 %vm234_vm2, %v2316_v1  ;;  %vm241_vm3 = vcmask 1043456   ;;  %v294_v7 = vld [vmem:[#allocation6] sm:$0xf]  ;;  %v2321_v21 = vld [vmem:[%s3144_s4 + $0x8] sm:$0xff]   ;;  %v2322_v25 = vld [vmem:[%s3144_s4 + $0x10] sm:$0xff]   ;;  %s2633_s24 = smov 32  }
  0x5c   :  { %2207 = vmatprep.subr.bf16.mxu0 %v2631_v0  ;;  %v243_v6 = vsel %vm241_vm3, %v228_v5, 0  ;;  %2302 = vmatprep.subr.msk.bf16.mxu1 %vm241_vm3, %v294_v7  ;;  %v307_v8 = vsel %vm241_vm3, %v294_v7, 0  ;;  %v2320_v19 = vld [vmem:[%s3144_s4] sm:$0xff]   ;;  %v2323_v26 = vld [vmem:[%s3144_s4 + $0x18] sm:$0xff]   ;;  %v1978_v28 = vld [vmem:[#allocation9] ss:$0 sm:$0xff] }
  0x5d   :  { %2220 = vmatpush3.bf16.msra.mxu1 %v307_v8  ;;  %v1981_v38 = vld [vmem:[#allocation9 + $0x1] ss:$0 sm:$0xff]  ;;  %vm377_vm4 = vcmask 261120   ;;  %vm412_vm5 = vcmask 523264   ;;  %v1984_v49 = vld [vmem:[#allocation9 + $0x2] ss:$0 sm:$0xff] }
  0x5e   :  { %2204 = vmatmul.mubr.msk.bf16.vlgmr.msra.gmra.mrb[0].mxu0 %vm126_vm1, %v2778_v2  ;;  %2237 = vmatprep.subr.bf16.mxu1 %v2631_v0  ;;  %vm1161_vm6 = vcmask 1041409   ;;  %vm1963_vm7 = vcmask 1024  }
  0x5f   :  { %2208 = vmatpush3.bf16.msra.mxu0 %v2318_v3  ;;  %2209 = vmatprep.mubr.msk.bf16.mxu0 %vm2632_vm0, %v2631_v0 }
  0x60   :  { %2301 = vmatprep.subr.msk.bf16.mxu0 %vm241_vm3, %v228_v5  ;;  %2222 = vmatmul.mubr.msk.bf16.vlgmr.msra.gmra.mrb[0].mxu1 %vm234_vm2, %v2318_v3 }
  0x61   :  { %2239 = vmatprep.mubr.msk.bf16.mxu1 %vm2632_vm0, %v2631_v0 }
  0x66   :  { %2210 = vmatmul.mubr.msk.bf16.vlgmr.msra.gmra.mrb[4].mxu0 %vm126_vm1, %v2788_v4 }
  0x67   :  { %2214 = vmatpush3.bf16.msra.mxu0 %v243_v6 }
  0x68   :  { %2225 = vmatprep.subr.bf16.mxu0 %v2320_v19 }
 0x131   :  { %v164_v9 = vpop.f32.mrb[0].mxu0 }
 0x132   :  { %v2205_v10 = vpop.f32.mrb[1].mxu0 }
 0x133   :  { %v167_v11 = vpop.f32.mrb[2].mxu0  ;;  %v2223_v20 = vpop.f32.mrb[0].mxu1 }
 0x134   :  { %v226_v12 = vpack.c.bf16 %v167_v11, %v164_v9  ;;  %v2206_v13 = vpop.f32.mrb[3].mxu0  ;;  %v343_v22 = vpop.f32.mrb[1].mxu1  ;;  %v352_v42 = vadd.f32 %v2223_v20, %v1981_v38 }
 0x135   :  { %v2224_v23 = vpop.f32.mrb[2].mxu1  ;;  %v344_v39 = vadd.f32 %v1981_v38, %v343_v22 }
 0x136   :  { %2215 = vmatprep.mubr.msk.bf16.mxu0 %vm234_vm2, %v226_v12  ;;  %v346_v24 = vpop.f32.mrb[3].mxu1  ;;  %v355_v43 = vadd.f32 %v2224_v23, %v1981_v38 }
 0x137   :  { %v347_v40 = vadd.f32 %v1981_v38, %v346_v24 }
 0x138   :  { %v368_v46 = vpack.c.bf16 %v355_v43, %v352_v42 }
 0x139   :  { %v219_v14 = vpop.f32.mrb[4].mxu0  ;;  %v367_v41 = vpack.c.bf16 %v347_v40, %v344_v39 }
 0x13a   :  { %v2211_v15 = vpop.f32.mrb[5].mxu0 }
 0x13b   :  { %v222_v16 = vpop.f32.mrb[6].mxu0 }
 0x13c   :  { %v227_v17 = vpack.c.bf16 %v222_v16, %v219_v14  ;;  %v2212_v18 = vpop.f32.mrb[7].mxu0 }
 0x13e   :  { %2216 = vmatmul.mubr.msk.bf16.vlgmr.msra.gmra.mrb[8].mxu0 %vm234_vm2, %v227_v17 }
 0x13f   :  { %2226 = vmatpush3.bf16.msra.mxu0 %v2320_v19 }
 0x140   :  { %2227 = vmatprep.subr.bf16.mxu0 %v2321_v21 }
 0x143   :  { %2228 = vmatpush3.bf16.msra.mxu0 %v2321_v21 }
 0x144   :  { %2229 = vmatprep.subr.bf16.mxu0 %v2322_v25 }
 0x147   :  { %2230 = vmatpush3.bf16.msra.mxu0 %v2322_v25 }
 0x148   :  { %2231 = vmatprep.subr.bf16.mxu0 %v2323_v26 }
 0x14b   :  { %2232 = vmatpush3.bf16.msra.mxu0 %v2323_v26 }
 0x211   :  { %v2217_v27 = vpop.f32.mrb[8].mxu0 }
 0x212   :  { %v279_v29 = vpop.f32.mrb[9].mxu0  ;;  %v2813_v36 = vadd.f32 %v2217_v27, %v1978_v28 }
 0x213   :  { %v2218_v30 = vpop.f32.mrb[10].mxu0  ;;  %v280_v32 = vadd.f32 %v1978_v28, %v279_v29 }
 0x214   :  { %v282_v31 = vpop.f32.mrb[11].mxu0  ;;  %v2811_v34 = vadd.f32 %v2218_v30, %v1978_v28 }
 0x215   :  { %v283_v33 = vadd.f32 %v1978_v28, %v282_v31  ;;  %v2324_v31 = vld [vmem:[%s3145_s5] sm:$0xff]  }
 0x216   :  { %v370_v37 = vpack.c.bf16 %v2811_v34, %v2813_v36  ;;  %2249 = vmatprep.subr.bf16.mxu0 %v2324_v31 }
 0x217   :  { %v369_v35 = vpack.c.bf16 %v283_v33, %v280_v32 }
 0x219   :  { %373 = vrot.lane.b32.xlu0 %v369_v35, %s2633_s24 }
 0x21d   :  { %375 = vrot.lane.b32.xlu0 %v370_v37, %s2633_s24 }
 0x28b   :  { %v374_v44 = vpop.permute.xlu0 %373 }
 0x28c   :  { %v380_v45 = vsel %vm377_vm4, %v367_v41, %v374_v44  ;;  %v2327_v44 = vld [vmem:[%s3146_s6 + $0x8] sm:$0xff]  }
 0x28d   :  { %2233 = vmatprep.mubr.msk.bf16.mxu0 %vm412_vm5, %v380_v45  ;;  %v2328_v45 = vld [vmem:[%s3146_s6 + $0x10] sm:$0xff]  }
 0x28f   :  { %v376_v47 = vpop.permute.xlu0 %375 }
 0x290   :  { %v383_v48 = vsel %vm377_vm4, %v368_v46, %v376_v47  ;;  %v2329_v46 = vld [vmem:[%s3146_s6 + $0x18] sm:$0xff]  }
 0x291   :  { %2234 = vmatmul.mubr.msk.bf16.vlgmr.msra.gmra.mrb[12].mxu0 %vm412_vm5, %v383_v48  ;;  %v1997_v48 = vld [vmem:[#allocation9 + $0x3] ss:$0 sm:$0xff] }
 0x292   :  { %2250 = vmatpush3.bf16.msra.mxu0 %v2324_v31 }
 0x364   :  { %v2235_v50 = vpop.f32.mrb[12].mxu0 }
 0x365   :  { %v460_v51 = vadd.f32 %v2235_v50, %v1984_v49  ;;  %v451_v52 = vpop.f32.mrb[13].mxu0 }
 0x366   :  { %v452_v53 = vadd.f32 %v1984_v49, %v451_v52  ;;  %v2236_v54 = vpop.f32.mrb[14].mxu0 }
 0x367   :  { %v1993_v55 = vmul.f32 -1.442695, %v460_v51  ;;  %v463_v56 = vadd.f32 %v2236_v54, %v1984_v49  ;;  %v454_v57 = vpop.f32.mrb[15].mxu0 }
 0x368   :  { %v1991_v58 = vmul.f32 -1.442695, %v452_v53  ;;  %v455_v59 = vadd.f32 %v1984_v49, %v454_v57 }
 0x369   :  { %2454 = vpow2.f32 %v1993_v55  ;;  %v1994_v60 = vmul.f32 -1.442695, %v463_v56 }
 0x36a   :  { %2456 = vpow2.f32 %v1991_v58  ;;  %v1992_v61 = vmul.f32 -1.442695, %v455_v59 }
 0x36b   :  { %2458 = vpow2.f32 %v1994_v60 }
 0x36c   :  { %2460 = vpow2.f32 %v1992_v61 }
 0x373   :  { %v2455_v62 = vpop.eup %2454 }
 0x374   :  { %v2457_v63 = vpop.eup %2456  ;;  %v480_v1 = vadd.f32 1.0, %v2455_v62  ;;  %v2002_v62 = vld [vmem:[#allocation9 + $0x4] ss:$0 sm:$0xff] }
 0x375   :  { %v2459_v3 = vpop.eup %2458  ;;  %v478_v5 = vadd.f32 1.0, %v2457_v63 }
 0x376   :  { %v2461_v6 = vpop.eup %2460  ;;  %2462 = vrcp.f32 %v480_v1  ;;  %v481_v7 = vadd.f32 1.0, %v2459_v3 }
 0x377   :  { %2464 = vrcp.f32 %v478_v5  ;;  %v479_v8 = vadd.f32 1.0, %v2461_v6 }
 0x378   :  { %2466 = vrcp.f32 %v481_v7 }
 0x379   :  { %2468 = vrcp.f32 %v479_v8 }
 0x380   :  { %v2463_v9 = vpop.eup %2462 }
 0x381   :  { %v2465_v10 = vpop.eup %2464  ;;  %v496_v17 = vsub.f32 1.0, %v2463_v9  ;;  %v492_v27 = vmul.f32 %v2463_v9, %v2813_v36 }
 0x382   :  { %v2467_v11 = vpop.eup %2466  ;;  %v494_v12 = vsub.f32 1.0, %v2465_v10  ;;  %v490_v18 = vmul.f32 %v2465_v10, %v280_v32  ;;  %v2325_v32 = vld [vmem:[%s3145_s5 + $0x8] sm:$0xff]  }
 0x383   :  { %v2469_v13 = vpop.eup %2468  ;;  %v497_v14 = vsub.f32 1.0, %v2467_v11  ;;  %v493_v24 = vmul.f32 %v2467_v11, %v2811_v34  ;;  %v500_v25 = vmul.f32 %v496_v17, %v352_v42  ;;  %2251 = vmatprep.subr.bf16.mxu0 %v2325_v32 }
 0x384   :  { %v495_v15 = vsub.f32 1.0, %v2469_v13  ;;  %v498_v16 = vmul.f32 %v494_v12, %v344_v39  ;;  %v491_v19 = vmul.f32 %v2469_v13, %v283_v33  ;;  %2252 = vmatpush3.bf16.msra.mxu0 %v2325_v32 }
 0x385   :  { %v501_v21 = vmul.f32 %v497_v14, %v355_v43  ;;  %v2833_v29 = vadd.f32 %v500_v25, %v492_v27  ;;  %2269 = vmatprep.subr.bf16.mxu0 %v2631_v0  ;;  %v2326_v43 = vld [vmem:[%s3146_s6] sm:$0xff]  }
 0x386   :  { %v499_v20 = vmul.f32 %v495_v15, %v347_v40  ;;  %v2823_v22 = vadd.f32 %v498_v16, %v490_v18 }
 0x387   :  { %v2831_v28 = vadd.f32 %v501_v21, %v493_v24 }
 0x388   :  { %v2825_v23 = vadd.f32 %v499_v20, %v491_v19 }
 0x389   :  { %v507_v30 = vpack.c.bf16 %v2831_v28, %v2833_v29 }
 0x38a   :  { %v506_v26 = vpack.c.bf16 %v2825_v23, %v2823_v22 }
 0x38c   :  { %2238 = vmatpush3.bf16.msra.mxu1 %v506_v26 }
 0x38d   :  { %2243 = vmatprep.subr.bf16.mxu1 %v2631_v0 }
 0x38f   :  { %2240 = vmatmul.mubr.msk.bf16.vlgmr.msra.gmra.mrb[4].mxu1 %vm126_vm1, %v2778_v2 }
 0x390   :  { %2244 = vmatpush3.bf16.msra.mxu1 %v507_v30  ;;  %2245 = vmatprep.mubr.msk.bf16.mxu1 %vm2632_vm0, %v2631_v0 }
 0x391   :  { %2257 = vmatprep.subr.bf16.mxu1 %v2326_v43 }
 0x397   :  { %2246 = vmatmul.mubr.msk.bf16.vlgmr.msra.gmra.mrb[8].mxu1 %vm126_vm1, %v2788_v4 }
 0x398   :  { %2258 = vmatpush3.bf16.msra.mxu1 %v2326_v43 }
 0x399   :  { %2259 = vmatprep.subr.bf16.mxu1 %v2327_v44 }
 0x39c   :  { %2260 = vmatpush3.bf16.msra.mxu1 %v2327_v44 }
 0x39d   :  { %2261 = vmatprep.subr.bf16.mxu1 %v2328_v45 }
 0x3a0   :  { %2262 = vmatpush3.bf16.msra.mxu1 %v2328_v45 }
 0x3a1   :  { %2263 = vmatprep.subr.bf16.mxu1 %v2329_v46 }
 0x3a4   :  { %2264 = vmatpush3.bf16.msra.mxu1 %v2329_v46 }
 0x462   :  { %v542_v33 = vpop.f32.mrb[4].mxu1 }
 0x463   :  { %v2241_v34 = vpop.f32.mrb[5].mxu1 }
 0x464   :  { %v545_v35 = vpop.f32.mrb[6].mxu1 }
 0x465   :  { %v590_v36 = vpack.c.bf16 %v545_v35, %v542_v33  ;;  %v2242_v37 = vpop.f32.mrb[7].mxu1 }
 0x467   :  { %2253 = vmatprep.mubr.msk.bf16.mxu0 %vm377_vm4, %v590_v36 }
 0x46a   :  { %v583_v38 = vpop.f32.mrb[8].mxu1 }
 0x46b   :  { %v2247_v39 = vpop.f32.mrb[9].mxu1 }
 0x46c   :  { %v586_v40 = vpop.f32.mrb[10].mxu1 }
 0x46d   :  { %v591_v41 = vpack.c.bf16 %v586_v40, %v583_v38  ;;  %v2248_v42 = vpop.f32.mrb[11].mxu1 }
 0x46f   :  { %2254 = vmatmul.mubr.msk.bf16.vlgmr.msra.gmra.mrb[16].mxu0 %vm377_vm4, %v591_v41 }
 0x470   :  { %2271 = vmatprep.mubr.msk.bf16.mxu0 %vm2632_vm0, %v2631_v0 }
 0x542   :  { %v2255_v47 = vpop.f32.mrb[16].mxu0 }
 0x543   :  { %v653_v49 = vpop.f32.mrb[17].mxu0  ;;  %v662_v56 = vadd.f32 %v2255_v47, %v1997_v48 }
 0x544   :  { %v2256_v50 = vpop.f32.mrb[18].mxu0  ;;  %v654_v52 = vadd.f32 %v1997_v48, %v653_v49 }
 0x545   :  { %v656_v51 = vpop.f32.mrb[19].mxu0  ;;  %v665_v54 = vadd.f32 %v2256_v50, %v1997_v48 }
 0x546   :  { %v657_v53 = vadd.f32 %v1997_v48, %v656_v51 }
 0x547   :  { %v678_v57 = vpack.c.bf16 %v665_v54, %v662_v56 }
 0x548   :  { %v677_v55 = vpack.c.bf16 %v657_v53, %v654_v52 }
 0x54a   :  { %681 = vrot.lane.b32.xlu1 %v677_v55, %s2633_s24  ;;  %v2334_v55 = vld [vmem:[%s3146_s6 + $0x30] sm:$0xff]  }
 0x54e   :  { %683 = vrot.lane.b32.xlu1 %v678_v57, %s2633_s24 }
 0x5bc   :  { %v682_v58 = vpop.permute.xlu1 %681 }
 0x5bd   :  { %v687_v59 = vsel %vm377_vm4, %v506_v26, %v682_v58  ;;  %v2019_v58 = vld [vmem:[#allocation9 + $0x5] ss:$0 sm:$0xff] }
 0x5be   :  { %2265 = vmatprep.mubr.msk.bf16.mxu1 %vm412_vm5, %v687_v59 }
 0x5c0   :  { %v684_v60 = vpop.permute.xlu1 %683 }
 0x5c1   :  { %v690_v61 = vsel %vm377_vm4, %v507_v30, %v684_v60 }
 0x5c2   :  { %2266 = vmatmul.mubr.msk.bf16.vlgmr.msra.gmra.mrb[12].mxu1 %vm412_vm5, %v690_v61 }
 0x695   :  { %v2267_v63 = vpop.f32.mrb[12].mxu1 }
 0x696   :  { %v766_v1 = vadd.f32 %v2267_v63, %v2002_v62  ;;  %v757_v3 = vpop.f32.mrb[13].mxu1 }
 0x697   :  { %v758_v5 = vadd.f32 %v2002_v62, %v757_v3  ;;  %v2268_v6 = vpop.f32.mrb[14].mxu1 }
 0x698   :  { %v2011_v7 = vmul.f32 -1.442695, %v766_v1  ;;  %v769_v8 = vadd.f32 %v2268_v6, %v2002_v62  ;;  %v760_v9 = vpop.f32.mrb[15].mxu1 }
 0x699   :  { %v2009_v10 = vmul.f32 -1.442695, %v758_v5  ;;  %v761_v11 = vadd.f32 %v2002_v62, %v760_v9 }
 0x69a   :  { %2470 = vpow2.f32 %v2011_v7  ;;  %v2012_v12 = vmul.f32 -1.442695, %v769_v8 }
 0x69b   :  { %2472 = vpow2.f32 %v2009_v10  ;;  %v2010_v13 = vmul.f32 -1.442695, %v761_v11  ;;  %v2336_v11 = vld [vmem:[%s3147_s7] ss:$8 sps:$4 sm:$0xff]  }
 0x69c   :  { %2474 = vpow2.f32 %v2012_v12  ;;  %v2338_v12 = vld [vmem:[%s3147_s7 + $0x4] ss:$8 sps:$4 sm:$0xff]  }
 0x69d   :  { %2476 = vpow2.f32 %v2010_v13  ;;  %v2341_v13 = vld [vmem:[%s3147_s7 + $0x14] ss:$8 sps:$4 sm:$0xff]  }
 0x6a4   :  { %v2471_v14 = vpop.eup %2470 }
 0x6a5   :  { %v2473_v15 = vpop.eup %2472  ;;  %v786_v16 = vadd.f32 1.0, %v2471_v14  ;;  %v2634_v14 = vmov 0  }
 0x6a6   :  { %v2475_v17 = vpop.eup %2474  ;;  %v784_v18 = vadd.f32 1.0, %v2473_v15  ;;  %v2339_v15 = vld [vmem:[%s3147_s7 + $0x10] ss:$8 sps:$4 sm:$0xff]  }
 0x6a7   :  { %v2477_v19 = vpop.eup %2476  ;;  %2478 = vrcp.f32 %v786_v16  ;;  %v787_v20 = vadd.f32 1.0, %v2475_v17  ;;  %v2344_v16 = vld [vmem:[%s3148_s8 + $0x4] ss:$8 sps:$4 sm:$0xff]  }
 0x6a8   :  { %2480 = vrcp.f32 %v784_v18  ;;  %v785_v21 = vadd.f32 1.0, %v2477_v19  ;;  %v2032_v17 = vld [vmem:[#allocation9 + $0x6] ss:$0 sm:$0xff] }
 0x6a9   :  { %2482 = vrcp.f32 %v787_v20 }
 0x6aa   :  { %2484 = vrcp.f32 %v785_v21 }
 0x6b1   :  { %v2479_v24 = vpop.eup %2478 }
 0x6b2   :  { %v2481_v25 = vpop.eup %2480  ;;  %v802_v34 = vsub.f32 1.0, %v2479_v24  ;;  %v798_v44 = vmul.f32 %v2479_v24, %v662_v56  ;;  %v2335_v56 = vld [vmem:[%s3146_s6 + $0x38] sm:$0xff]  }
 0x6b3   :  { %v2483_v26 = vpop.eup %2482  ;;  %v800_v27 = vsub.f32 1.0, %v2481_v25  ;;  %v796_v35 = vmul.f32 %v2481_v25, %v654_v52 }
 0x6b4   :  { %v2485_v30 = vpop.eup %2484  ;;  %v803_v31 = vsub.f32 1.0, %v2483_v26  ;;  %v799_v41 = vmul.f32 %v2483_v26, %v665_v54  ;;  %v806_v42 = vmul.f32 %v802_v34, %v2833_v29  ;;  %v2331_v29 = vld [vmem:[%s3145_s5 + $0x18] sm:$0xff]   ;;  %v2333_v54 = vld [vmem:[%s3146_s6 + $0x28] sm:$0xff]  }
 0x6b5   :  { %v801_v32 = vsub.f32 1.0, %v2485_v30  ;;  %v804_v33 = vmul.f32 %v800_v27, %v2823_v22  ;;  %v797_v36 = vmul.f32 %v2485_v30, %v657_v53  ;;  %v2332_v53 = vld [vmem:[%s3146_s6 + $0x20] sm:$0xff]  }
 0x6b6   :  { %v807_v38 = vmul.f32 %v803_v31, %v2831_v28  ;;  %v2885_v22 = vadd.f32 %v806_v42, %v798_v44  ;;  %v2330_v28 = vld [vmem:[%s3145_s5 + $0x10] sm:$0xff]  }
 0x6b7   :  { %v805_v37 = vmul.f32 %v801_v32, %v2825_v23  ;;  %v2876_v39 = vadd.f32 %v804_v33, %v796_v35  ;;  %2281 = vmatprep.subr.bf16.mxu1 %v2330_v28 }
 0x6b8   :  { %v2883_v45 = vadd.f32 %v807_v38, %v799_v41  ;;  %2282 = vmatpush3.bf16.msra.mxu1 %v2330_v28 }
 0x6b9   :  { %v2878_v40 = vadd.f32 %v805_v37, %v797_v36  ;;  %2283 = vmatprep.subr.bf16.mxu1 %v2331_v29 }
 0x6ba   :  { %v813_v23 = vpack.c.bf16 %v2883_v45, %v2885_v22 }
 0x6bb   :  { %v812_v43 = vpack.c.bf16 %v2878_v40, %v2876_v39 }
 0x6bc   :  { %2284 = vmatpush3.bf16.msra.mxu1 %v2331_v29 }
 0x6bd   :  { %2270 = vmatpush3.bf16.msra.mxu0 %v812_v43  ;;  %1187 = vmatprep.subr.bf16.mxu1 %v2338_v12 }
 0x6be   :  { %2275 = vmatprep.subr.bf16.mxu0 %v2631_v0 }
 0x6c0   :  { %2272 = vmatmul.mubr.msk.bf16.vlgmr.msra.gmra.mrb[20].mxu0 %vm126_vm1, %v2778_v2 }
 0x6c1   :  { %2276 = vmatpush3.bf16.msra.mxu0 %v813_v23  ;;  %2277 = vmatprep.mubr.msk.bf16.mxu0 %vm2632_vm0, %v2631_v0 }
 0x6c2   :  { %2289 = vmatprep.subr.bf16.mxu0 %v2332_v53 }
 0x6c8   :  { %2278 = vmatmul.mubr.msk.bf16.vlgmr.msra.gmra.mrb[24].mxu0 %vm126_vm1, %v2788_v4 }
 0x6c9   :  { %2290 = vmatpush3.bf16.msra.mxu0 %v2332_v53 }
 0x6ca   :  { %2291 = vmatprep.subr.bf16.mxu0 %v2333_v54 }
 0x6cd   :  { %2292 = vmatpush3.bf16.msra.mxu0 %v2333_v54 }
 0x6ce   :  { %2293 = vmatprep.subr.bf16.mxu0 %v2334_v55 }
 0x6d1   :  { %2294 = vmatpush3.bf16.msra.mxu0 %v2334_v55 }
 0x6d2   :  { %2295 = vmatprep.subr.bf16.mxu0 %v2335_v56 }
 0x6d5   :  { %2296 = vmatpush3.bf16.msra.mxu0 %v2335_v56 }
 0x793   :  { %v848_v2 = vpop.f32.mrb[20].mxu0 }
 0x794   :  { %v2273_v46 = vpop.f32.mrb[21].mxu0 }
 0x795   :  { %v851_v47 = vpop.f32.mrb[22].mxu0 }
 0x796   :  { %v896_v48 = vpack.c.bf16 %v851_v47, %v848_v2  ;;  %v2274_v0 = vpop.f32.mrb[23].mxu0 }
 0x798   :  { %2285 = vmatprep.mubr.msk.bf16.mxu1 %vm377_vm4, %v896_v48 }
 0x79b   :  { %v889_v4 = vpop.f32.mrb[24].mxu0 }
 0x79c   :  { %v2279_v49 = vpop.f32.mrb[25].mxu0 }
 0x79d   :  { %v892_v50 = vpop.f32.mrb[26].mxu0 }
 0x79e   :  { %v897_v51 = vpack.c.bf16 %v892_v50, %v889_v4  ;;  %v2280_v52 = vpop.f32.mrb[27].mxu0 }
 0x7a0   :  { %2286 = vmatmul.mubr.msk.bf16.vlgmr.msra.gmra.mrb[16].mxu1 %vm377_vm4, %v897_v51 }
 0x7a1   :  { %1219 = vmatprep.mubr.bf16.mxu1 %v2634_v14  ;;  %1188 = vmatpush1.bf16.msra.mxu1 %v2336_v11 }
 0x7a2   :  { %1189 = vmatprep.subr.bf16.mxu1 %v2341_v13 }
 0x7a5   :  { %1190 = vmatpush1.bf16.msra.mxu1 %v2339_v15 }
 0x7a6   :  { %1467 = vmatprep.subr.bf16.mxu1 %v2344_v16 }
 0x873   :  { %v2287_v57 = vpop.f32.mrb[16].mxu1 }
 0x874   :  { %v960_v59 = vpop.f32.mrb[17].mxu1  ;;  %v969_v61 = vadd.f32 %v2287_v57, %v2019_v58 }
 0x875   :  { %v2288_v60 = vpop.f32.mrb[18].mxu1  ;;  %v961_v1 = vadd.f32 %v2019_v58, %v960_v59 }
 0x876   :  { %v2916_v62 = vadd.f32 %v2288_v60, %v2019_v58  ;;  %v963_v63 = vpop.f32.mrb[19].mxu1 }
 0x877   :  { %v2918_v3 = vadd.f32 %v2019_v58, %v963_v63 }
 0x878   :  { %v986_v5 = vpack.c.bf16 %v2916_v62, %v969_v61 }
 0x879   :  { %v985_v6 = vpack.c.bf16 %v2918_v3, %v961_v1 }
 0x87a   :  { %991 = vrot.lane.b32.xlu1 %v986_v5, %s2633_s24 }
 0x87b   :  { %989 = vrot.lane.b32.xlu0 %v985_v6, %s2633_s24 }
 0x8ec   :  { %v992_v7 = vpop.permute.xlu1 %991 }
 0x8ed   :  { %v990_v8 = vpop.permute.xlu0 %989  ;;  %v998_v10 = vsel %vm377_vm4, %v813_v23, %v992_v7 }
 0x8ee   :  { %v995_v9 = vsel %vm377_vm4, %v812_v43, %v990_v8 }
 0x8ef   :  { %2297 = vmatprep.mubr.msk.bf16.mxu0 %vm412_vm5, %v995_v9 }
 0x8f0   :  { %2298 = vmatmul.mubr.msk.bf16.vlgmr.msra.gmra.mrb[28].mxu0 %vm412_vm5, %v998_v10 }
 0x9c3   :  { %v2299_v18 = vpop.f32.mrb[28].mxu0 }
 0x9c4   :  { %v1074_v19 = vadd.f32 %v2299_v18, %v2032_v17  ;;  %v1065_v20 = vpop.f32.mrb[29].mxu0 }
 0x9c5   :  { %v1066_v21 = vadd.f32 %v2032_v17, %v1065_v20  ;;  %v2300_v24 = vpop.f32.mrb[30].mxu0  ;;  %v2345_v20 = vld [vmem:[%s3148_s8 + $0x10] ss:$8 sps:$4 sm:$0xff]  }
 0x9c6   :  { %v2041_v25 = vmul.f32 -1.442695, %v1074_v19  ;;  %v1077_v26 = vadd.f32 %v2300_v24, %v2032_v17  ;;  %v1068_v27 = vpop.f32.mrb[31].mxu0  ;;  %v2347_v19 = vld [vmem:[%s3148_s8 + $0x14] ss:$8 sps:$4 sm:$0xff]  }
 0x9c7   :  { %v2039_v30 = vmul.f32 -1.442695, %v1066_v21  ;;  %v1069_v31 = vadd.f32 %v2032_v17, %v1068_v27  ;;  %v2342_v17 = vld [vmem:[%s3148_s8] ss:$8 sps:$4 sm:$0xff]   ;;  %v2350_v21 = vld [vmem:[%s3148_s8 + $0x24] ss:$8 sps:$4 sm:$0xff]  }
 0x9c8   :  { %2486 = vpow2.f32 %v2041_v25  ;;  %v2042_v32 = vmul.f32 -1.442695, %v1077_v26  ;;  %v2348_v24 = vld [vmem:[%s3148_s8 + $0x20] ss:$8 sps:$4 sm:$0xff]   ;;  %v2353_v25 = vld [vmem:[%s3148_s8 + $0x34] ss:$8 sps:$4 sm:$0xff]  }
 0x9c9   :  { %2488 = vpow2.f32 %v2039_v30  ;;  %v2040_v33 = vmul.f32 -1.442695, %v1069_v31  ;;  %v2351_v26 = vld [vmem:[%s3148_s8 + $0x30] ss:$8 sps:$4 sm:$0xff]   ;;  %v2356_v27 = vld [vmem:[%s3148_s8 + $0x44] ss:$8 sps:$4 sm:$0xff]  }
 0x9ca   :  { %2490 = vpow2.f32 %v2042_v32  ;;  %v2354_v30 = vld [vmem:[%s3148_s8 + $0x40] ss:$8 sps:$4 sm:$0xff]   ;;  %v2359_v31 = vld [vmem:[%s3148_s8 + $0x54] ss:$8 sps:$4 sm:$0xff]   ;;  %v2357_v32 = vld [vmem:[%s3148_s8 + $0x50] ss:$8 sps:$4 sm:$0xff]  }
 0x9cb   :  { %2492 = vpow2.f32 %v2040_v33  ;;  %v2362_v33 = vld [vmem:[%s3148_s8 + $0x64] ss:$8 sps:$4 sm:$0xff]  }
 0x9d2   :  { %v2487_v34 = vpop.eup %2486 }
 0x9d3   :  { %v2489_v35 = vpop.eup %2488  ;;  %v1094_v36 = vadd.f32 1.0, %v2487_v34  ;;  %v2360_v34 = vld [vmem:[%s3148_s8 + $0x60] ss:$8 sps:$4 sm:$0xff]  }
 0x9d4   :  { %v2491_v37 = vpop.eup %2490  ;;  %v1092_v38 = vadd.f32 1.0, %v2489_v35  ;;  %v2365_v35 = vld [vmem:[%s3148_s8 + $0x74] ss:$8 sps:$4 sm:$0xff]  }
 0x9d5   :  { %v2493_v41 = vpop.eup %2492  ;;  %2494 = vrcp.f32 %v1094_v36  ;;  %v1095_v42 = vadd.f32 1.0, %v2491_v37  ;;  %v2363_v36 = vld [vmem:[%s3148_s8 + $0x70] ss:$8 sps:$4 sm:$0xff]   ;;  %v2368_v37 = vld [vmem:[%s3148_s8 + $0x84] ss:$8 sps:$4 sm:$0xff]  }
 0x9d6   :  { %2496 = vrcp.f32 %v1092_v38  ;;  %v1093_v43 = vadd.f32 1.0, %v2493_v41  ;;  %v2366_v38 = vld [vmem:[%s3148_s8 + $0x80] ss:$8 sps:$4 sm:$0xff]   ;;  %v2371_v41 = vld [vmem:[%s3148_s8 + $0x94] ss:$8 sps:$4 sm:$0xff]  }
 0x9d7   :  { %2498 = vrcp.f32 %v1095_v42  ;;  %v2369_v42 = vld [vmem:[%s3148_s8 + $0x90] ss:$8 sps:$4 sm:$0xff]  }
 0x9d8   :  { %2500 = vrcp.f32 %v1093_v43  ;;  %v2374_v43 = vld [vmem:[%s3148_s8 + $0xa4] ss:$8 sps:$4 sm:$0xff]  }
 0x9df   :  { %v2495_v44 = vpop.eup %2494 }
 0x9e0   :  { %v2497_v23 = vpop.eup %2496  ;;  %v1110_v28 = vsub.f32 1.0, %v2495_v44  ;;  %v1106_v47 = vmul.f32 %v2495_v44, %v969_v61  ;;  %v2372_v44 = vld [vmem:[%s3148_s8 + $0xa0] ss:$8 sps:$4 sm:$0xff]  }
 0x9e1   :  { %v2499_v29 = vpop.eup %2498  ;;  %v1108_v2 = vsub.f32 1.0, %v2497_v23  ;;  %v1104_v4 = vmul.f32 %v2497_v23, %v961_v1  ;;  %v2377_v23 = vld [vmem:[%s3148_s8 + $0xb4] ss:$8 sps:$4 sm:$0xff]  }
 0x9e2   :  { %v2501_v46 = vpop.eup %2500  ;;  %v1114_v48 = vmul.f32 %v1110_v28, %v2885_v22  ;;  %v1111_v0 = vsub.f32 1.0, %v2499_v29  ;;  %v1107_v52 = vmul.f32 %v2499_v29, %v2916_v62  ;;  %v2375_v28 = vld [vmem:[%s3148_s8 + $0xb0] ss:$8 sps:$4 sm:$0xff]   ;;  %v2380_v29 = vld [vmem:[%s3148_s8 + $0xc4] ss:$8 sps:$4 sm:$0xff]  }
 0x9e3   :  { %v1112_v49 = vmul.f32 %v1108_v2, %v2876_v39  ;;  %v1109_v50 = vsub.f32 1.0, %v2501_v46  ;;  %v1105_v55 = vmul.f32 %v2501_v46, %v2918_v3  ;;  %v2378_v2 = vld [vmem:[%s3148_s8 + $0xc0] ss:$8 sps:$4 sm:$0xff]   ;;  %v2383_v46 = vld [vmem:[%s3148_s8 + $0xd4] ss:$8 sps:$4 sm:$0xff]  }
 0x9e4   :  { %v1118_v51 = vadd.f32 %v1114_v48, %v1106_v47  ;;  %v1115_v53 = vmul.f32 %v1111_v0, %v2883_v45  ;;  %v2381_v47 = vld [vmem:[%s3148_s8 + $0xd0] ss:$8 sps:$4 sm:$0xff]   ;;  %v2386_v48 = vld [vmem:[%s3148_s8 + $0xe4] ss:$8 sps:$4 sm:$0xff]   ;;  %v2384_v0 = vld [vmem:[%s3148_s8 + $0xe0] ss:$8 sps:$4 sm:$0xff]  }
 0x9e5   :  { %v1116_v54 = vadd.f32 %v1112_v49, %v1104_v4  ;;  %v1113_v56 = vmul.f32 %v1109_v50, %v2878_v40  ;;  %v2389_v4 = vld [vmem:[%s3148_s8 + $0xf4] ss:$8 sps:$4 sm:$0xff]   ;;  %v2387_v49 = vld [vmem:[%s3148_s8 + $0xf0] ss:$8 sps:$4 sm:$0xff]  }
 0x9e6   :  { %v1119_v57 = vadd.f32 %v1115_v53, %v1107_v52  ;;  %v1129_v59 = vsel %vm377_vm4, %v1118_v51, 0.0  ;;  %v2390_v50 = vld [vmem:[#allocation7] ss:$8 sps:$4 sm:$0xff]   ;;  %v2392_v51 = vld [vmem:[#allocation7 + $0x4] ss:$8 sps:$4 sm:$0xff]  }
 0x9e7   :  { %v1117_v58 = vadd.f32 %v1113_v56, %v1105_v55  ;;  %v1120_v60 = vsel %vm377_vm4, %v1116_v54, 0.0  ;;  %v2395_v52 = vld [vmem:[#allocation7 + $0x14] ss:$8 sps:$4 sm:$0xff]   ;;  %1745 = vmatprep.subr.bf16.mxu0 %v2392_v51  ;;  %v2393_v53 = vld [vmem:[#allocation7 + $0x10] ss:$8 sps:$4 sm:$0xff]   ;;  %v2443_v51 = vld [vmem:[%s3150_s10 + $0x10] sm:$0xff]  }
 0x9e8   :  { %v1130_v22 = vsel %vm377_vm4, %v1119_v57, 0.0  ;;  %1746 = vmatpush1.bf16.msra.mxu0 %v2390_v50  ;;  %v2398_v54 = vld [vmem:[#allocation7 + $0x24] ss:$8 sps:$4 sm:$0xff]   ;;  %v2396_v55 = vld [vmem:[#allocation7 + $0x20] ss:$8 sps:$4 sm:$0xff]  }
 0x9e9   :  { %v1131_v39 = vadd.f32 %v1130_v22, %v1129_v59  ;;  %v1121_v61 = vsel %vm377_vm4, %v1117_v58, 0.0  ;;  %1747 = vmatprep.subr.bf16.mxu0 %v2395_v52  ;;  %v2401_v56 = vld [vmem:[#allocation7 + $0x34] ss:$8 sps:$4 sm:$0xff]   ;;  %v2399_v57 = vld [vmem:[#allocation7 + $0x30] ss:$8 sps:$4 sm:$0xff]   ;;  %v2442_v50 = vld [vmem:[%s3150_s10 + $0x50] sm:$0xff]  }
 0x9ea   :  { %v1122_v63 = vadd.f32 %v1121_v61, %v1120_v60  ;;  %v2404_v58 = vld [vmem:[#allocation7 + $0x44] ss:$8 sps:$4 sm:$0xff]   ;;  %v2402_v59 = vld [vmem:[#allocation7 + $0x40] ss:$8 sps:$4 sm:$0xff]   ;;  %v2407_v22 = vld [vmem:[#allocation7 + $0x54] ss:$8 sps:$4 sm:$0xff]  }
 0x9eb   :  { %v1132_v62 = vrot.slane %v1131_v39, 4  ;;  %v2405_v60 = vld [vmem:[#allocation7 + $0x50] ss:$8 sps:$4 sm:$0xff]   ;;  %v2408_v61 = vld [vmem:[#allocation7 + $0x60] ss:$8 sps:$4 sm:$0xff]  }
 0x9ec   :  { %v1123_v1 = vrot.slane %v1122_v63, 4  ;;  %1748 = vmatpush1.bf16.msra.mxu0 %v2393_v53  ;;  %v2444_v52 = vld [vmem:[%s3150_s10 + $0x58] sm:$0xff]  }
 0x9ed   :  { %v1133_v45 = vadd.f32 %v1132_v62, %v1131_v39  ;;  %1749 = vmatprep.subr.bf16.mxu0 %v2398_v54  ;;  %v2410_v39 = vld [vmem:[#allocation7 + $0x64] ss:$8 sps:$4 sm:$0xff]   ;;  %v2411_v62 = vld [vmem:[#allocation7 + $0x70] ss:$8 sps:$4 sm:$0xff]  }
 0x9ee   :  { %v1124_v5 = vadd.f32 %v1123_v1, %v1122_v63  ;;  %v2413_v63 = vld [vmem:[#allocation7 + $0x74] ss:$8 sps:$4 sm:$0xff]   ;;  %v2416_v1 = vld [vmem:[#allocation7 + $0x84] ss:$8 sps:$4 sm:$0xff]  }
 0x9ef   :  { %v1134_v6 = vrot.slane %v1133_v45, 2  ;;  %v2445_v53 = vld [vmem:[%s3150_s10 + $0x18] sm:$0xff]   ;;  %v2446_v54 = vld [vmem:[%s3150_s10 + $0x60] sm:$0xff]  }
 0x9f0   :  { %v1125_v3 = vrot.slane %v1124_v5, 2  ;;  %1750 = vmatpush1.bf16.msra.mxu0 %v2396_v55  ;;  %v2447_v55 = vld [vmem:[%s3150_s10 + $0x20] sm:$0xff]  }
 0x9f1   :  { %v1135_v7 = vadd.f32 %v1134_v6, %v1133_v45  ;;  %1751 = vmatprep.subr.bf16.mxu0 %v2401_v56  ;;  %v2414_v45 = vld [vmem:[#allocation7 + $0x80] ss:$8 sps:$4 sm:$0xff]   ;;  %v2417_v6 = vld [vmem:[#allocation7 + $0x90] ss:$8 sps:$4 sm:$0xff]  }
 0x9f2   :  { %v1126_v40 = vadd.f32 %v1125_v3, %v1124_v5  ;;  %v2419_v5 = vld [vmem:[#allocation7 + $0x94] ss:$8 sps:$4 sm:$0xff]   ;;  %v2422_v3 = vld [vmem:[#allocation7 + $0xa4] ss:$8 sps:$4 sm:$0xff]  }
 0x9f3   :  { %v1136_v8 = vrot.slane %v1135_v7, 1  ;;  %v2448_v56 = vld [vmem:[%s3150_s10 + $0x68] sm:$0xff]  }
 0x9f4   :  { %v1127_v9 = vrot.slane %v1126_v40, 1  ;;  %1752 = vmatpush1.bf16.msra.mxu0 %v2399_v57  ;;  %v2449_v57 = vld [vmem:[%s3150_s10 + $0x28] sm:$0xff]  }
 0x9f5   :  { %v1137_v10 = vadd.f32 %v1136_v8, %v1135_v7  ;;  %1753 = vmatprep.subr.bf16.mxu0 %v2404_v58  ;;  %v2420_v7 = vld [vmem:[#allocation7 + $0xa0] ss:$8 sps:$4 sm:$0xff]   ;;  %v2423_v8 = vld [vmem:[#allocation7 + $0xb0] ss:$8 sps:$4 sm:$0xff]  }
 0x9f6   :  { %v1128_v11 = vadd.f32 %v1127_v9, %v1126_v40  ;;  %v2425_v40 = vld [vmem:[#allocation7 + $0xb4] ss:$8 sps:$4 sm:$0xff]   ;;  %v2428_v9 = vld [vmem:[#allocation7 + $0xc4] ss:$8 sps:$4 sm:$0xff]  }
 0x9f7   :  { %v1139_v12 = vpack.c.bf16 %v1137_v10, %v1137_v10  ;;  %v2426_v10 = vld [vmem:[#allocation7 + $0xc0] ss:$8 sps:$4 sm:$0xff]  }
 0x9f8   :  { %v1138_v13 = vpack.c.bf16 %v1128_v11, %v1128_v11  ;;  %1754 = vmatpush1.bf16.msra.mxu0 %v2402_v59  ;;  %v2431_v11 = vld [vmem:[#allocation7 + $0xd4] ss:$8 sps:$4 sm:$0xff]   ;;  %v2450_v58 = vld [vmem:[%s3150_s10 + $0x70] sm:$0xff]   ;;  %v2050_v59 = vld [vmem:[%s3152_s12 + $0x3] ss:$8 sm:$0x3] }
 0x9f9   :  { %v1160_v14 = vunpack.c.l.b16 %v1139_v12  ;;  %1755 = vmatprep.subr.bf16.mxu0 %v2407_v22  ;;  %v2429_v12 = vld [vmem:[#allocation7 + $0xd0] ss:$8 sps:$4 sm:$0xff]   ;;  %v2083_v22 = vld [vmem:[%s3152_s12 + $0x4] ss:$8 sm:$0x3] }
 0x9fa   :  { %v1159_v15 = vunpack.c.l.b16 %v1138_v13  ;;  %v1147_v13 = vlaneseq }
 0x9fc   :  { %v1162_v16 = vsel %vm1161_vm6, %v1160_v14, %v1159_v15  ;;  %1756 = vmatpush1.bf16.msra.mxu0 %v2405_v60  ;;  %v1148_v14 = vshrl.u32 %v1147_v13, 7  ;;  %v1144_v15 = vld [vmem:[%s3152_s12] ss:$8 sm:$0x3] }
 0x9fd   :  { %v1163_v18 = vpack.c.b16 %v1162_v16, %v1162_v16  ;;  %1757 = vmatprep.subr.bf16.mxu0 %v2410_v39  ;;  %v1145_v16 = vmul.f32 16.0, %v1144_v15  ;;  %v2084_v39 = vld [vmem:[%s3152_s12 + $0x5] ss:$8 sm:$0x3]  ;;  %v2451_v15 = vld [vmem:[%s3150_s10 + $0x30] sm:$0xff]  }
 0x9ff   :  { %2047 = vmatmul.mubr.msk.bf16.vlgmr.msra.gmra.mrb[20].mxu1 %vm377_vm4, %v1163_v18  ;;  %v3052_v18 = vsub.s32 1, %v1148_v14 }
 0xa00   :  { %1468 = vmatpush1.bf16.msra.mxu1 %v2342_v17  ;;  %1758 = vmatpush1.bf16.msra.mxu0 %v2408_v61  ;;  %v3050_v17 = vsub.s32 0, %v1148_v14 }
 0xa01   :  { %1469 = vmatprep.subr.bf16.mxu1 %v2347_v19  ;;  %1759 = vmatprep.subr.bf16.mxu0 %v2413_v63  ;;  %v2048_v19 = vld [vmem:[%s3152_s12 + $0x1] ss:$8 sm:$0x3]  ;;  %v1304_v61 = vrot.slane %v2050_v59, %v3052_v18 }
 0xa02   :  { %v1300_v60 = vrot.slane %v2050_v59, %v3050_v17  ;;  %v1514_v63 = vrot.slane %v2083_v22, %v3050_v17 }
 0xa04   :  { %1470 = vmatpush1.bf16.msra.mxu1 %v2345_v20  ;;  %1760 = vmatpush1.bf16.msra.mxu0 %v2411_v62  ;;  %v1150_v20 = vrot.slane %v1145_v16, %v3050_v17 }
 0xa05   :  { %1471 = vmatprep.subr.bf16.mxu1 %v2350_v21  ;;  %1761 = vmatprep.subr.bf16.mxu0 %v2416_v1  ;;  %v2049_v21 = vld [vmem:[%s3152_s12 + $0x2] ss:$8 sm:$0x3]  ;;  %v1518_v1 = vrot.slane %v2083_v22, %v3052_v18 }
 0xa08   :  { %1472 = vmatpush1.bf16.msra.mxu1 %v2348_v24  ;;  %1762 = vmatpush1.bf16.msra.mxu0 %v2414_v45  ;;  %v1154_v24 = vrot.slane %v1145_v16, %v3052_v18  ;;  %v2452_v16 = vld [vmem:[%s3150_s10 + $0x78] sm:$0xff]  }
 0xa09   :  { %1473 = vmatprep.subr.bf16.mxu1 %v2353_v25  ;;  %1763 = vmatprep.subr.bf16.mxu0 %v2419_v5  ;;  %v1234_v25 = vrot.slane %v2048_v19, %v3050_v17  ;;  %v1529_v5 = vrot.slane %v2084_v39, %v3050_v17 }
 0xa0c   :  { %1474 = vmatpush1.bf16.msra.mxu1 %v2351_v26  ;;  %1764 = vmatpush1.bf16.msra.mxu0 %v2417_v6 }
 0xa0d   :  { %1475 = vmatprep.subr.bf16.mxu1 %v2356_v27  ;;  %1765 = vmatprep.subr.bf16.mxu0 %v2422_v3  ;;  %v1238_v27 = vrot.slane %v2048_v19, %v3052_v18  ;;  %v2453_v19 = vld [vmem:[%s3150_s10 + $0x38] sm:$0xff]  }
 0xa10   :  { %1476 = vmatpush1.bf16.msra.mxu1 %v2354_v30  ;;  %1766 = vmatpush1.bf16.msra.mxu0 %v2420_v7 }
 0xa11   :  { %1477 = vmatprep.subr.bf16.mxu1 %v2359_v31  ;;  %1767 = vmatprep.subr.bf16.mxu0 %v2425_v40  ;;  %v1249_v31 = vrot.slane %v2049_v21, %v3050_v17  ;;  %v1533_v40 = vrot.slane %v2084_v39, %v3052_v18 }
 0xa14   :  { %1478 = vmatpush1.bf16.msra.mxu1 %v2357_v32  ;;  %1768 = vmatpush1.bf16.msra.mxu0 %v2423_v8 }
 0xa15   :  { %1479 = vmatprep.subr.bf16.mxu1 %v2362_v33  ;;  %1769 = vmatprep.subr.bf16.mxu0 %v2428_v9 }
 0xa18   :  { %1480 = vmatpush1.bf16.msra.mxu1 %v2360_v34  ;;  %1770 = vmatpush1.bf16.msra.mxu0 %v2426_v10  ;;  %v1253_v34 = vrot.slane %v2049_v21, %v3052_v18 }
 0xa19   :  { %1481 = vmatprep.subr.bf16.mxu1 %v2365_v35  ;;  %1771 = vmatprep.subr.bf16.mxu0 %v2431_v11 }
 0xa1c   :  { %1482 = vmatpush1.bf16.msra.mxu1 %v2363_v36  ;;  %1772 = vmatpush1.bf16.msra.mxu0 %v2429_v12 }
 0xa1d   :  { %1483 = vmatprep.subr.bf16.mxu1 %v2368_v37 }
 0xa20   :  { %1484 = vmatpush1.bf16.msra.mxu1 %v2366_v38 }
 0xa21   :  { %1485 = vmatprep.subr.bf16.mxu1 %v2371_v41 }
 0xa24   :  { %1486 = vmatpush1.bf16.msra.mxu1 %v2369_v42 }
 0xa25   :  { %1487 = vmatprep.subr.bf16.mxu1 %v2374_v43 }
 0xa28   :  { %1488 = vmatpush1.bf16.msra.mxu1 %v2372_v44 }
 0xa29   :  { %1489 = vmatprep.subr.bf16.mxu1 %v2377_v23 }
 0xa2c   :  { %1490 = vmatpush1.bf16.msra.mxu1 %v2375_v28 }
 0xa2d   :  { %1491 = vmatprep.subr.bf16.mxu1 %v2380_v29  ;;  %v2434_v29 = vld [vmem:[#allocation7 + $0xe4] ss:$8 sps:$4 sm:$0xff]  }
 0xa2e   :  { %1773 = vmatprep.subr.bf16.mxu0 %v2434_v29 }
 0xa30   :  { %1492 = vmatpush1.bf16.msra.mxu1 %v2378_v2  ;;  %v2432_v2 = vld [vmem:[#allocation7 + $0xe0] ss:$8 sps:$4 sm:$0xff]  }
 0xa31   :  { %1493 = vmatprep.subr.bf16.mxu1 %v2383_v46  ;;  %1774 = vmatpush1.bf16.msra.mxu0 %v2432_v2  ;;  %v2437_v46 = vld [vmem:[#allocation7 + $0xf4] ss:$8 sps:$4 sm:$0xff]  }
 0xa32   :  { %1775 = vmatprep.subr.bf16.mxu0 %v2437_v46 }
 0xa34   :  { %1494 = vmatpush1.bf16.msra.mxu1 %v2381_v47  ;;  %v2435_v47 = vld [vmem:[#allocation7 + $0xf0] ss:$8 sps:$4 sm:$0xff]  }
 0xa35   :  { %1495 = vmatprep.subr.bf16.mxu1 %v2386_v48  ;;  %1776 = vmatpush1.bf16.msra.mxu0 %v2435_v47  ;;  %v2438_v48 = vld [vmem:[%s3150_s10 + $0x40] sm:$0xff]  }
 0xa38   :  { %1496 = vmatpush1.bf16.msra.mxu1 %v2384_v0  ;;  %v2439_v0 = vld [vmem:[%s3150_s10] sm:$0xff]  }
 0xa39   :  { %1497 = vmatprep.subr.bf16.mxu1 %v2389_v4  ;;  %v2440_v4 = vld [vmem:[%s3150_s10 + $0x48] sm:$0xff]  }
 0xa3c   :  { %1498 = vmatpush1.bf16.msra.mxu1 %v2387_v49  ;;  %v2441_v49 = vld [vmem:[%s3150_s10 + $0x8] sm:$0xff]  }
 0xa3d   :  { %2179 = vmatprep.subr.bf16.mxu1 %v2438_v48 }
 0xad2   :  { %v1221_v26 = vpop.f32.mrb[20].mxu1 }
 0xad3   :  { %v1222_v30 = vadd.f32 %v1221_v26, %v1150_v20  ;;  %v1223_v32 = vpop.f32.mrb[21].mxu1  ;;  %v2085_v20 = vld [vmem:[%s3152_s12 + $0x6] ss:$8 sm:$0x3] }
 0xad4   :  { %v1224_v33 = vadd.f32 %v1223_v32, %v1154_v24  ;;  %v1225_v35 = vpop.f32.mrb[22].mxu1  ;;  %v1578_v21 = vrot.slane %v2085_v20, %v3050_v17  ;;  %v1582_v24 = vrot.slane %v2085_v20, %v3052_v18 }
 0xad5   :  { %v1241_v36 = vmul.f32 %v1234_v25, %v1222_v30  ;;  %v1226_v37 = vpop.f32.mrb[23].mxu1 }
 0xad6   :  { %v1242_v38 = vmul.f32 %v1238_v27, %v1224_v33 }
 0xad7   :  { %v1256_v41 = vadd.f32 %v1249_v31, %v1241_v36  ;;  %v1820_v36 = vld [vmem:[%s3152_s12 + $0x7] ss:$0 sm:$0xff] }
 0xad8   :  { %v1257_v42 = vadd.f32 %v1253_v34, %v1242_v38 }
 0xad9   :  { %v1258_v43 = vmax.f32 %v1256_v41, 0.0 }
 0xada   :  { %v1259_v44 = vmax.f32 %v1257_v42, 0.0 }
 0xadb   :  { %v1260_v28 = vpack.c.bf16 %v1258_v43, %v1258_v43 }
 0xadc   :  { %v1261_v23 = vpack.c.bf16 %v1259_v44, %v1259_v44 }
 0xade   :  { %1499 = vmatprep.mubr.bf16.mxu1 %v1261_v23 }
 0xadf   :  { %1500 = vmatmul.mubr.bf16.vlgmr.msra.gmra.mrb[24].mxu1 %v1260_v28 }
 0xae0   :  { %2180 = vmatpush3.bf16.msra.mxu1 %v2439_v0 }
 0xae1   :  { %2181 = vmatprep.subr.bf16.mxu1 %v2440_v4 }
 0xae4   :  { %2182 = vmatpush3.bf16.msra.mxu1 %v2441_v49 }
 0xae5   :  { %2183 = vmatprep.subr.bf16.mxu1 %v2442_v50 }
 0xae8   :  { %2184 = vmatpush3.bf16.msra.mxu1 %v2443_v51 }
 0xae9   :  { %2185 = vmatprep.subr.bf16.mxu1 %v2444_v52 }
 0xaec   :  { %2186 = vmatpush3.bf16.msra.mxu1 %v2445_v53 }
 0xaed   :  { %2187 = vmatprep.subr.bf16.mxu1 %v2446_v54 }
 0xaf0   :  { %2188 = vmatpush3.bf16.msra.mxu1 %v2447_v55 }
 0xaf1   :  { %2189 = vmatprep.subr.bf16.mxu1 %v2448_v56 }
 0xaf4   :  { %2190 = vmatpush3.bf16.msra.mxu1 %v2449_v57 }
 0xaf5   :  { %2191 = vmatprep.subr.bf16.mxu1 %v2450_v58 }
 0xaf8   :  { %2192 = vmatpush3.bf16.msra.mxu1 %v2451_v15 }
 0xaf9   :  { %2193 = vmatprep.subr.bf16.mxu1 %v2452_v16 }
 0xafc   :  { %2194 = vmatpush3.bf16.msra.mxu1 %v2453_v19 }
 0xbb2   :  { %v1501_v62 = vpop.f32.mrb[24].mxu1 }
 0xbb3   :  { %v1502_v45 = vadd.f32 %v1501_v62, %v1300_v60  ;;  %v1503_v6 = vpop.f32.mrb[25].mxu1 }
 0xbb4   :  { %v1504_v3 = vadd.f32 %v1503_v6, %v1304_v61  ;;  %v1505_v7 = vpop.f32.mrb[26].mxu1 }
 0xbb5   :  { %v1521_v8 = vmul.f32 %v1514_v63, %v1502_v45  ;;  %v1506_v9 = vpop.f32.mrb[27].mxu1 }
 0xbb6   :  { %v1522_v10 = vmul.f32 %v1518_v1, %v1504_v3 }
 0xbb7   :  { %v1536_v11 = vadd.f32 %v1529_v5, %v1521_v8 }
 0xbb8   :  { %v1537_v12 = vadd.f32 %v1533_v40, %v1522_v10 }
 0xbb9   :  { %v1538_v14 = vpack.c.bf16 %v1536_v11, %v1536_v11 }
 0xbba   :  { %v1539_v13 = vpack.c.bf16 %v1537_v12, %v1537_v12 }
 0xbbc   :  { %1777 = vmatprep.mubr.bf16.mxu0 %v1539_v13 }
 0xbbd   :  { %1778 = vmatmul.mubr.bf16.vlgmr.msra.gmra.mrb[32].mxu0 %v1538_v14 }
 0xc90   :  { %v1779_v25 = vpop.f32.mrb[32].mxu0 }
 0xc91   :  { %v1780_v26 = vadd.f32 %v1779_v25, %v1578_v21  ;;  %v1781_v27 = vpop.f32.mrb[33].mxu0 }
 0xc92   :  { %v1782_v30 = vadd.f32 %v1781_v27, %v1582_v24  ;;  %v1783_v31 = vpop.f32.mrb[34].mxu0 }
 0xc93   :  { %v1784_v32 = vpop.f32.mrb[35].mxu0  ;;  %v1786_v34 = vpack.c.bf16 %v1780_v26, %v1780_v26 }
 0xc94   :  { %v1787_v33 = vpack.c.bf16 %v1782_v30, %v1782_v30 }
 0xc96   :  { %1949 = vmatprep.mubr.bf16.mxu1 %v1787_v33 }
 0xc97   :  { %1950 = vmatmul.mubr.bf16.vlgmr.msra.gmra.mrb[28].mxu1 %v1786_v34 }
 0xd6a   :  { %v2195_v35 = vpop.f32.mrb[28].mxu1 }
 0xd6b   :  { %v2196_v37 = vpop.f32.mrb[29].mxu1 }
 0xd6c   :  { %v2197_v38 = vadd.f32 %v2196_v37, %v2195_v35  ;;  %v2198_v17 = vpop.f32.mrb[30].mxu1 }
 0xd6d   :  { %v2199_v41 = vpop.f32.mrb[31].mxu1 }
 0xd6e   :  { %v1952_v18 = vadd.f32 %v2197_v38, %v1820_v36 }
 0xd70   :  { %v2134_v42 = vmul.f32 -1.442695, %v1952_v18 }
 0xd72   :  { %2502 = vpow2.f32 %v2134_v42 }
 0xd7c   :  { %v2503_v43 = vpop.eup %2502 }
 0xd7d   :  { %v1960_v44 = vadd.f32 1.0, %v2503_v43 }
 0xd7f   :  { %2504 = vrcp.f32 %v1960_v44 }
 0xd89   :  { %v2505_v23 = vpop.eup %2504 }
 0xd8a   :  { %1964 = vst.msk [vmem:[%s3153_s13] sm:$0x3] %vm1963_vm7, %v2505_v23 }
 0xd8b   :  { %1969 = vsyncpa [#allocation3], 1 }
 0xd8c   :  { %1970 = vsyncpa [#allocation5], 1 }
 0xd8d   :  { %1971 = vsyncpa [#allocation8], 1 }

</bundles_post_ra>
